<compile_context>
chip_gen: v7x
topology: tpu7x:2x2x1
jax: 0.10.0
libtpu: 0.0.40
codegen_flags: <defaults>
</compile_context>

<pallas_src>
import math

import jax
import jax.numpy as jnp
from jax.experimental import pallas as pl
from jax.experimental.pallas import tpu as pltpu


def _round_up(x, m):
    return ((x + m - 1) // m) * m


def _blk_bytes(shape, itemsize):
    s = list(shape)
    s[-1] = _round_up(s[-1], 128)
    if len(s) >= 2:
        s[-2] = _round_up(s[-2], 8)
    n = 1
    for d in s:
        n *= d
    return n * itemsize


def _choose_tiles(N, Cin, HW, itemsize, per_buffer_budget=12 << 20):
    """Pick (TB, TCin) so one streamed fmap block stays within the VMEM budget."""
    HWp = _round_up(HW, 128)

    def blk(tb, tc):
        return tb * _round_up(tc, 8) * HWp * itemsize

    tb_cands = [t for t in (256, 128, 64, 32, 16, 8) if t <= N] or [N]
    tc_cands = [Cin] + [c for c in (1024, 512, 256, 128, 64, 32, 16, 8)
                        if c < Cin and Cin % c == 0]
    for tb in tb_cands:                       # prefer large M (MXU utilization)
        for tc in tc_cands:                   # then the largest Cin slice
            if blk(tb, tc) <= per_buffer_budget:
                return tb, tc
    return tb_cands[-1], tc_cands[-1]


def pgcn_kernel(fmap_ref, trans_w_ref, bn_shift_ref, w_fc_ref, b_fc_ref,
                adj_t_ref, adj_rowsum_ref, w1_ref, w2_row_ref, out_ref,
                feat_acc):
    c = pl.program_id(1)

    @pl.when(c == 0)
    def _():
        feat_acc[...] = jnp.zeros_like(feat_acc)

    # ---- nn.MaxPool2d(14,14): global max over H*W (lane axis) for this Cin
    #      slice, then the partial transition (1x1 conv) contraction over it.
    pooled = jnp.max(fmap_ref[...], axis=-1)                       # (TB, TCin)
    feat_acc[...] += jnp.dot(pooled, trans_w_ref[...],
                             preferred_element_type=jnp.float32)   # (TB, Cout)

    @pl.when(c == pl.num_programs(1) - 1)
    def _():
        # BN shift (scale pre-folded into the transition weight)
        feat = feat_acc[...] + bn_shift_ref[...]                   # (TB, Cout) f32
        feat_c = feat.astype(w_fc_ref.dtype)

        # fc branch: y = feat @ W_fc^T + b_fc
        y = jnp.dot(feat_c, w_fc_ref[...],
                    preferred_element_type=jnp.float32) + b_fc_ref[...]

        # gc1 on x = broadcast(feat): adj @ (x @ W1) == rowsum(adj) (outer) (feat@W1)
        v = jnp.dot(feat_c, w1_ref[...],
                    preferred_element_type=jnp.float32)            # (TB, Cout)

        # LeakyReLU(0.2) + gc2 first contraction, exact, with no (nc, Cout)
        # intermediate:  leaky(r*v) = r*max(v,.2v) if r >= 0 else r*min(v,.2v)
        w2 = w2_row_ref[...]                                       # (1, Cout) f32
        p_pos = jnp.sum(jnp.maximum(v, 0.2 * v) * w2, axis=1, keepdims=True)
        p_neg = jnp.sum(jnp.minimum(v, 0.2 * v) * w2, axis=1, keepdims=True)
        r = adj_rowsum_ref[...]                                    # (1, ncp)
        s2 = jnp.where(r >= 0, r * p_pos, r * p_neg)               # (TB, ncp)

        # gc2 second adjacency product: out2[b,i] = sum_j adj[i,j] * s2[b,j]
        out2 = jnp.dot(s2, adj_t_ref[...],
                       preferred_element_type=jnp.float32)         # (TB, ncp)

        # out = gc2(x).view(B, -1) + fc(feature)
        out_ref[...] = (out2 + y).astype(out_ref.dtype)


def pgcn_forward(fmap, trans_w, bn_scale, bn_shift, w_fc_t, b_fc, adj, w1, w2):
    """fmap: backbone output, NCHW (N, Cin, H, W).  Returns (N, num_classes)."""
    N, Cin, H, W = fmap.shape
    Cout = trans_w.shape[1]
    nc = adj.shape[0]
    HW = H * W

    compute_dtype = fmap.dtype            # pass a bf16 fmap for bf16 streaming
    itemsize = jnp.dtype(compute_dtype).itemsize

    # free reshape: native layout, no transpose / no pad of the dominant operand
    fmap3 = fmap.reshape(N, Cin, HW)

    TB, TCin = _choose_tiles(N, Cin, HW, itemsize)
    nb = pl.cdiv(N, TB)
    ncb = Cin // TCin

    # pad num_classes to a lane-dense multiple of 128 (padding is inert, sliced off)
    ncp = _round_up(max(nc, 1), 128)
    adj_f = adj.astype(jnp.float32)
    adj_p = jnp.zeros((ncp, ncp), jnp.float32).at[:nc, :nc].set(adj_f)
    adj_t = adj_p.T                                                  # (ncp, ncp)
    adj_rowsum = jnp.sum(adj_p, axis=1).reshape(1, ncp)
    w_fc_p = (jnp.zeros((Cout, ncp), jnp.float32)
              .at[:, :nc].set(w_fc_t.astype(jnp.float32))).astype(compute_dtype)
    b_fc_p = jnp.zeros((1, ncp), jnp.float32).at[:, :nc].set(
        b_fc.reshape(1, nc).astype(jnp.float32))

    # fold BN scale into the 1x1-conv weight columns; keep shift as a bias
    trans_w_f = (trans_w.astype(jnp.float32)
                 * bn_scale.reshape(1, Cout).astype(jnp.float32)).astype(compute_dtype)
    bn_shift_r = bn_shift.reshape(1, Cout).astype(jnp.float32)
    w1_c = w1.astype(compute_dtype)
    w2_row = w2.reshape(1, Cout).astype(jnp.float32)

    def build(single_buffer_consts):
        def const_spec(shape):
            nd = len(shape)
            if single_buffer_consts:
                return pl.BlockSpec(shape, lambda b, c, _n=nd: (0,) * _n,
                                    pipeline_mode=pl.Buffered(1))
            return pl.BlockSpec(shape, lambda b, c, _n=nd: (0,) * _n)

        n_const_buf = 1 if single_buffer_consts else 2
        est = (2 * _blk_bytes((TB, TCin, HW), itemsize)      # streamed fmap block
               + 2 * _blk_bytes((TCin, Cout), itemsize)      # transition weight slice
               + n_const_buf * (_blk_bytes((1, Cout), 4)
                                + _blk_bytes((Cout, ncp), itemsize)
                                + _blk_bytes((1, ncp), 4)
                                + _blk_bytes((ncp, ncp), 4)
                                + _blk_bytes((1, ncp), 4)
                                + _blk_bytes((Cout, Cout), itemsize)
                                + _blk_bytes((1, Cout), 4))
               + 2 * _blk_bytes((TB, ncp), 4)                # output block
               + _blk_bytes((TB, Cout), 4))                  # feat accumulator
        vmem_limit = min(56 << 20, max(32 << 20, int(est * 1.25) + (2 << 20)))

        batch_sem = "parallel" if nb > 1 else "arbitrary"

        return pl.pallas_call(
            pgcn_kernel,
            out_shape=jax.ShapeDtypeStruct((N, ncp), jnp.float32),
            grid_spec=pltpu.PrefetchScalarGridSpec(
                num_scalar_prefetch=0,
                grid=(nb, ncb),
                in_specs=[
                    pl.BlockSpec((TB, TCin, HW), lambda b, c: (b, c, 0)),  # fmap
                    pl.BlockSpec((TCin, Cout), lambda b, c: (c, 0)),       # trans W
                    const_spec((1, Cout)),     # BN shift
                    const_spec((Cout, ncp)),   # fc weight (transposed, nc-padded)
                    const_spec((1, ncp)),      # fc bias (nc-padded)
                    const_spec((ncp, ncp)),    # gen_adj(A)^T
                    const_spec((1, ncp)),      # rowsum(gen_adj(A))
                    const_spec((Cout, Cout)),  # gc1 weight
                    const_spec((1, Cout)),     # gc2 weight as a row
                ],
                out_specs=pl.BlockSpec((TB, ncp), lambda b, c: (b, 0)),
                scratch_shapes=[pltpu.VMEM((TB, Cout), jnp.float32)],
            ),
            compiler_params=pltpu.CompilerParams(
                dimension_semantics=(batch_sem, "arbitrary"),
                vmem_limit_bytes=vmem_limit),
        )

    operands = (fmap3, trans_w_f, bn_shift_r, w_fc_p, b_fc_p,
                adj_t, adj_rowsum, w1_c, w2_row)
    try:
        out_full = build(single_buffer_consts=True)(*operands)
    except Exception:
        # pl.Buffered(1) unsupported on this JAX build -> default double buffering
        out_full = build(single_buffer_consts=False)(*operands)

    return out_full[:, :nc]


def gen_adj(A):
    # D = diag(A.sum(1) ** -0.5);  adj = (A @ D).T @ D = D @ A.T @ D
    D = jnp.power(jnp.sum(A, axis=1), -0.5)
    return D[:, None] * A.T * D[None, :]


def reference_forward(fmap, trans_w, bn_scale, bn_shift, w_fc_t, b_fc, adj, w1, w2):
    nc = adj.shape[0]
    pooled = jnp.max(fmap, axis=(2, 3))
    feat = pooled @ trans_w
    feat = feat * bn_scale + bn_shift
    y = feat @ w_fc_t + b_fc.reshape(1, -1)
    x = jnp.repeat(feat[:, None, :], nc, axis=1)
    s1 = jnp.einsum('bnc,cd->bnd', x, w1)
    h1 = jnp.einsum('ij,bjd->bid', adj, s1)
    h1 = jnp.where(h1 > 0, h1, 0.2 * h1)
    s2 = jnp.einsum('bnd,do->bno', h1, w2)
    h2 = jnp.einsum('ij,bjo->bio', adj, s2)
    return h2[..., 0] + y


if __name__ == "__main__":
    # Small shapes standing in for the real model:
    #   C_backbone (2048) -> 64, out_channel -> 32, num_classes -> 8, H=W=14
    N, Cin, Cout, nc, H, W = 2, 64, 32, 8, 14, 14

    key = jax.random.PRNGKey(0)
    k_fmap, k_A, k_conv, k_fcw, k_fcb, k_w1, k_w2 = jax.random.split(key, 7)

    # backbone output feature map (synthetic)
    fmap = jax.random.normal(k_fmap, (N, Cin, H, W), dtype=jnp.float32)

    # fixed adjacency parameter A (positive entries so row sums > 0)
    A = jax.random.uniform(k_A, (nc, nc), minval=0.1, maxval=1.0, dtype=jnp.float32)
    adj = gen_adj(A)

    # transition: Conv2d(Cin, Cout, 1, bias=False) -> matmul weight (Cin, Cout)
    conv_bound = 1.0 / math.sqrt(Cin)
    conv_w = jax.random.uniform(k_conv, (Cout, Cin), minval=-conv_bound,
                                maxval=conv_bound, dtype=jnp.float32)
    trans_w = conv_w.T

    # BatchNorm2d(Cout), eval mode, default init (gamma=1, beta=0, mean=0, var=1)
    gamma = jnp.ones((Cout,), jnp.float32)
    beta = jnp.zeros((Cout,), jnp.float32)
    run_mean = jnp.zeros((Cout,), jnp.float32)
    run_var = jnp.ones((Cout,), jnp.float32)
    eps = 1e-5
    bn_scale = (gamma / jnp.sqrt(run_var + eps)).reshape(1, Cout)
    bn_shift = (beta - run_mean * gamma / jnp.sqrt(run_var + eps)).reshape(1, Cout)

    # fc: Linear(Cout, nc)
    fc_bound = 1.0 / math.sqrt(Cout)
    w_fc = jax.random.uniform(k_fcw, (nc, Cout), minval=-fc_bound,
                              maxval=fc_bound, dtype=jnp.float32)
    b_fc = jax.random.uniform(k_fcb, (nc,), minval=-fc_bound,
                              maxval=fc_bound, dtype=jnp.float32)
    w_fc_t = w_fc.T

    # gc1: GraphConvolution(Cout, Cout), stdv = 1/sqrt(out_features)
    stdv1 = 1.0 / math.sqrt(Cout)
    w1 = jax.random.uniform(k_w1, (Cout, Cout), minval=-stdv1, maxval=stdv1,
                            dtype=jnp.float32)
    # gc2: GraphConvolution(Cout, 1), stdv = 1/sqrt(1) = 1
    w2 = jax.random.uniform(k_w2, (Cout, 1), minval=-1.0, maxval=1.0,
                            dtype=jnp.float32)

    ref = reference_forward(fmap, trans_w, bn_scale, bn_shift, w_fc_t, b_fc,
                            adj, w1, w2)

    # f32 streaming path (exact-precision check)
    out = pgcn_forward(fmap, trans_w, bn_scale, bn_shift, w_fc_t, b_fc,
                       adj, w1, w2)
    out = jax.block_until_ready(out)
    assert out.shape == (N, nc), out.shape
    assert jnp.allclose(out, ref, rtol=1e-4, atol=1e-4), (out, ref)

    # bf16 streaming path (recommended at real shapes; f32 accumulation kept)
    out_bf16 = pgcn_forward(fmap.astype(jnp.bfloat16), trans_w, bn_scale,
                            bn_shift, w_fc_t, b_fc, adj, w1, w2)
    out_bf16 = jax.block_until_ready(out_bf16)
    assert jnp.allclose(out_bf16.astype(jnp.float32), ref,
                        rtol=5e-2, atol=1e-1), (out_bf16, ref)

    print("KERNEL_OK")
</pallas_src>

<mosaic_0001>
module attributes {stable_mosaic.version = 11 : i64} {
  func.func @pgcn_kernel(%arg0: i32, %arg1: i32, %arg2: memref<2x64x196xf32, #tpu.memory_space<vmem>>, %arg3: memref<64x32xf32, #tpu.memory_space<vmem>>, %arg4: memref<1x32xf32, #tpu.memory_space<vmem>>, %arg5: memref<32x128xf32, #tpu.memory_space<vmem>>, %arg6: memref<1x128xf32, #tpu.memory_space<vmem>>, %arg7: memref<128x128xf32, #tpu.memory_space<vmem>>, %arg8: memref<1x128xf32, #tpu.memory_space<vmem>>, %arg9: memref<32x32xf32, #tpu.memory_space<vmem>>, %arg10: memref<1x32xf32, #tpu.memory_space<vmem>>, %arg11: memref<2x128xf32, #tpu.memory_space<vmem>>, %arg12: memref<2x32xf32, #tpu.memory_space<vmem>>) attributes {dimension_semantics = [#tpu.dimension_semantics<arbitrary>, #tpu.dimension_semantics<arbitrary>], iteration_bounds = array<i64: 1, 1>, scalar_prefetch = 0 : i64, scratch_operands = 1 : i64, tpu.core_type = #tpu.core_type<tc>, window_params = [{transform_indices = @transform_0, window_bounds = array<i64: 2, 64, 196>}, {transform_indices = @transform_1, window_bounds = array<i64: 64, 32>}, {pipeline_mode = #tpu.pipeline_mode<synchronous>, transform_indices = @transform_2, window_bounds = array<i64: 1, 32>}, {pipeline_mode = #tpu.pipeline_mode<synchronous>, transform_indices = @transform_3, window_bounds = array<i64: 32, 128>}, {pipeline_mode = #tpu.pipeline_mode<synchronous>, transform_indices = @transform_4, window_bounds = array<i64: 1, 128>}, {pipeline_mode = #tpu.pipeline_mode<synchronous>, transform_indices = @transform_5, window_bounds = array<i64: 128, 128>}, {pipeline_mode = #tpu.pipeline_mode<synchronous>, transform_indices = @transform_6, window_bounds = array<i64: 1, 128>}, {pipeline_mode = #tpu.pipeline_mode<synchronous>, transform_indices = @transform_7, window_bounds = array<i64: 32, 32>}, {pipeline_mode = #tpu.pipeline_mode<synchronous>, transform_indices = @transform_8, window_bounds = array<i64: 1, 32>}, {transform_indices = @transform_9, window_bounds = array<i64: 2, 128>}]} {
    %c0_i32 = arith.constant 0 : i32
    %0 = arith.cmpi eq, %arg1, %c0_i32 : i32
    %1 = arith.extui %0 : i1 to i32
    %c0_i32_0 = arith.constant 0 : i32
    %2 = arith.cmpi ne, %1, %c0_i32_0 : i32
    scf.if %2 {
      %cst_12 = arith.constant 0.000000e+00 : f32
      %13 = vector.broadcast %cst_12 : f32 to vector<2x32xf32>
      %c0_13 = arith.constant 0 : index
      %c0_14 = arith.constant 0 : index
      %14 = vector.load %arg12[%c0_13, %c0_14] : memref<2x32xf32, #tpu.memory_space<vmem>>, vector<2x32xf32>
      tpu.vector_store %arg12[%c0_13, %c0_14], %13 {strides = array<i32>} : memref<2x32xf32, #tpu.memory_space<vmem>>, vector<2x32xf32>,
    } else {
    }
    %c0 = arith.constant 0 : index
    %c0_1 = arith.constant 0 : index
    %c0_2 = arith.constant 0 : index
    %3 = vector.load %arg2[%c0, %c0_1, %c0_2] : memref<2x64x196xf32, #tpu.memory_space<vmem>>, vector<2x64x196xf32>
    %cst = arith.constant dense<0xFF800000> : vector<2x64xf32>
    %4 = vector.multi_reduction <maximumf>, %3, %cst [2] : vector<2x64x196xf32> to vector<2x64xf32>
    %c0_3 = arith.constant 0 : index
    %c0_4 = arith.constant 0 : index
    %5 = vector.load %arg12[%c0_3, %c0_4] : memref<2x32xf32, #tpu.memory_space<vmem>>, vector<2x32xf32>
    %c0_5 = arith.constant 0 : index
    %c0_6 = arith.constant 0 : index
    %6 = vector.load %arg3[%c0_5, %c0_6] : memref<64x32xf32, #tpu.memory_space<vmem>>, vector<64x32xf32>
    %cst_7 = arith.constant dense<0.000000e+00> : vector<2x32xf32>
    %7 = tpu.matmul %4, %6, %cst_7 {dimension_numbers = #tpu.dot_dimension_numbers<[1], [0], [0], [1], [0, 0, 1, 1], [], []>} : vector<2x64xf32>, vector<64x32xf32>, vector<2x32xf32> -> vector<2x32xf32>
    %8 = arith.addf %5, %7 : vector<2x32xf32>
    %c0_8 = arith.constant 0 : index
    %c0_9 = arith.constant 0 : index
    %9 = vector.load %arg12[%c0_8, %c0_9] : memref<2x32xf32, #tpu.memory_space<vmem>>, vector<2x32xf32>
    tpu.vector_store %arg12[%c0_8, %c0_9], %8 {strides = array<i32>} : memref<2x32xf32, #tpu.memory_space<vmem>>, vector<2x32xf32>,
    %c0_i32_10 = arith.constant 0 : i32
    %10 = arith.cmpi eq, %arg1, %c0_i32_10 : i32
    %11 = arith.extui %10 : i1 to i32
    %c0_i32_11 = arith.constant 0 : i32
    %12 = arith.cmpi ne, %11, %c0_i32_11 : i32
    scf.if %12 {
      %c0_12 = arith.constant 0 : index
      %c0_13 = arith.constant 0 : index
      %13 = vector.load %arg12[%c0_12, %c0_13] : memref<2x32xf32, #tpu.memory_space<vmem>>, vector<2x32xf32>
      %c0_14 = arith.constant 0 : index
      %c0_15 = arith.constant 0 : index
      %14 = vector.load %arg4[%c0_14, %c0_15] : memref<1x32xf32, #tpu.memory_space<vmem>>, vector<1x32xf32>
      %15 = vector.broadcast %14 : vector<1x32xf32> to vector<2x32xf32>
      %16 = arith.addf %13, %15 : vector<2x32xf32>
      %c0_16 = arith.constant 0 : index
      %c0_17 = arith.constant 0 : index
      %17 = vector.load %arg5[%c0_16, %c0_17] : memref<32x128xf32, #tpu.memory_space<vmem>>, vector<32x128xf32>
      %cst_18 = arith.constant dense<0.000000e+00> : vector<2x128xf32>
      %18 = tpu.matmul %16, %17, %cst_18 {dimension_numbers = #tpu.dot_dimension_numbers<[1], [0], [0], [1], [0, 0, 1, 1], [], []>} : vector<2x32xf32>, vector<32x128xf32>, vector<2x128xf32> -> vector<2x128xf32>
      %c0_19 = arith.constant 0 : index
      %c0_20 = arith.constant 0 : index
      %19 = vector.load %arg6[%c0_19, %c0_20] : memref<1x128xf32, #tpu.memory_space<vmem>>, vector<1x128xf32>
      %20 = vector.broadcast %19 : vector<1x128xf32> to vector<2x128xf32>
      %21 = arith.addf %18, %20 : vector<2x128xf32>
      %c0_21 = arith.constant 0 : index
      %c0_22 = arith.constant 0 : index
      %22 = vector.load %arg9[%c0_21, %c0_22] : memref<32x32xf32, #tpu.memory_space<vmem>>, vector<32x32xf32>
      %cst_23 = arith.constant dense<0.000000e+00> : vector<2x32xf32>
      %23 = tpu.matmul %16, %22, %cst_23 {dimension_numbers = #tpu.dot_dimension_numbers<[1], [0], [0], [1], [0, 0, 1, 1], [], []>} : vector<2x32xf32>, vector<32x32xf32>, vector<2x32xf32> -> vector<2x32xf32>
      %c0_24 = arith.constant 0 : index
      %c0_25 = arith.constant 0 : index
      %24 = vector.load %arg10[%c0_24, %c0_25] : memref<1x32xf32, #tpu.memory_space<vmem>>, vector<1x32xf32>
      %cst_26 = arith.constant 2.000000e-01 : f32
      %25 = vector.broadcast %cst_26 : f32 to vector<2x32xf32>
      %26 = arith.mulf %25, %23 : vector<2x32xf32>
      %27 = arith.maximumf %23, %26 : vector<2x32xf32>
      %28 = vector.broadcast %24 : vector<1x32xf32> to vector<2x32xf32>
      %29 = arith.mulf %27, %28 : vector<2x32xf32>
      %cst_27 = arith.constant dense<0.000000e+00> : vector<2xf32>
      %30 = vector.multi_reduction <add>, %29, %cst_27 [1] : vector<2x32xf32> to vector<2xf32>
      %31 = vector.shape_cast %30 : vector<2xf32> to vector<2x1xf32>
      %cst_28 = arith.constant 2.000000e-01 : f32
      %32 = vector.broadcast %cst_28 : f32 to vector<2x32xf32>
      %33 = arith.mulf %32, %23 : vector<2x32xf32>
      %34 = arith.minimumf %23, %33 : vector<2x32xf32>
      %35 = vector.broadcast %24 : vector<1x32xf32> to vector<2x32xf32>
      %36 = arith.mulf %34, %35 : vector<2x32xf32>
      %cst_29 = arith.constant dense<0.000000e+00> : vector<2xf32>
      %37 = vector.multi_reduction <add>, %36, %cst_29 [1] : vector<2x32xf32> to vector<2xf32>
      %38 = vector.shape_cast %37 : vector<2xf32> to vector<2x1xf32>
      %c0_30 = arith.constant 0 : index
      %c0_31 = arith.constant 0 : index
      %39 = vector.load %arg8[%c0_30, %c0_31] : memref<1x128xf32, #tpu.memory_space<vmem>>, vector<1x128xf32>
      %cst_32 = arith.constant 0.000000e+00 : f32
      %40 = vector.broadcast %cst_32 : f32 to vector<1x128xf32>
      %41 = arith.cmpf oge, %39, %40 : vector<1x128xf32>
      %42 = vector.broadcast %39 : vector<1x128xf32> to vector<2x128xf32>
      %43 = vector.broadcast %31 : vector<2x1xf32> to vector<2x128xf32>
      %44 = arith.mulf %42, %43 : vector<2x128xf32>
      %45 = vector.broadcast %39 : vector<1x128xf32> to vector<2x128xf32>
      %46 = vector.broadcast %38 : vector<2x1xf32> to vector<2x128xf32>
      %47 = arith.mulf %45, %46 : vector<2x128xf32>
      %48 = vector.shape_cast %41 : vector<1x128xi1> to vector<1x128xi1>
      %49 = vector.broadcast %48 : vector<1x128xi1> to vector<2x128xi1>
      %50 = arith.select %49, %44, %47 : vector<2x128xi1>, vector<2x128xf32>
      %c0_33 = arith.constant 0 : index
      %c0_34 = arith.constant 0 : index
      %51 = vector.load %arg7[%c0_33, %c0_34] : memref<128x128xf32, #tpu.memory_space<vmem>>, vector<128x128xf32>
      %cst_35 = arith.constant dense<0.000000e+00> : vector<2x128xf32>
      %52 = tpu.matmul %50, %51, %cst_35 {dimension_numbers = #tpu.dot_dimension_numbers<[1], [0], [0], [1], [0, 0, 1, 1], [], []>} : vector<2x128xf32>, vector<128x128xf32>, vector<2x128xf32> -> vector<2x128xf32>
      %53 = arith.addf %52, %21 : vector<2x128xf32>
      %c0_36 = arith.constant 0 : index
      %c0_37 = arith.constant 0 : index
      %54 = vector.load %arg11[%c0_36, %c0_37] : memref<2x128xf32, #tpu.memory_space<vmem>>, vector<2x128xf32>
      tpu.vector_store %arg11[%c0_36, %c0_37], %53 {strides = array<i32>} : memref<2x128xf32, #tpu.memory_space<vmem>>, vector<2x128xf32>,
    } else {
    }
    return
  }
  func.func @transform_0(%arg0: i32, %arg1: i32) -> (i32, i32, i32) {
    %c0_i32 = arith.constant 0 : i32
    %c0_i32_0 = arith.constant 0 : i32
    return %arg0, %arg1, %c0_i32 : i32, i32, i32
  }
  func.func @transform_1(%arg0: i32, %arg1: i32) -> (i32, i32) {
    %c0_i32 = arith.constant 0 : i32
    %c0_i32_0 = arith.constant 0 : i32
    return %arg1, %c0_i32 : i32, i32
  }
  func.func @transform_2(%arg0: i32, %arg1: i32) -> (i32, i32) {
    %c0_i32 = arith.constant 0 : i32
    %c0_i32_0 = arith.constant 0 : i32
    %c0_i32_1 = arith.constant 0 : i32
    return %c0_i32, %c0_i32_0 : i32, i32
  }
  func.func @transform_3(%arg0: i32, %arg1: i32) -> (i32, i32) {
    %c0_i32 = arith.constant 0 : i32
    %c0_i32_0 = arith.constant 0 : i32
    %c0_i32_1 = arith.constant 0 : i32
    return %c0_i32, %c0_i32_0 : i32, i32
  }
  func.func @transform_4(%arg0: i32, %arg1: i32) -> (i32, i32) {
    %c0_i32 = arith.constant 0 : i32
    %c0_i32_0 = arith.constant 0 : i32
    %c0_i32_1 = arith.constant 0 : i32
    return %c0_i32, %c0_i32_0 : i32, i32
  }
  func.func @transform_5(%arg0: i32, %arg1: i32) -> (i32, i32) {
    %c0_i32 = arith.constant 0 : i32
    %c0_i32_0 = arith.constant 0 : i32
    %c0_i32_1 = arith.constant 0 : i32
    return %c0_i32, %c0_i32_0 : i32, i32
  }
  func.func @transform_6(%arg0: i32, %arg1: i32) -> (i32, i32) {
    %c0_i32 = arith.constant 0 : i32
    %c0_i32_0 = arith.constant 0 : i32
    %c0_i32_1 = arith.constant 0 : i32
    return %c0_i32, %c0_i32_0 : i32, i32
  }
  func.func @transform_7(%arg0: i32, %arg1: i32) -> (i32, i32) {
    %c0_i32 = arith.constant 0 : i32
    %c0_i32_0 = arith.constant 0 : i32
    %c0_i32_1 = arith.constant 0 : i32
    return %c0_i32, %c0_i32_0 : i32, i32
  }
  func.func @transform_8(%arg0: i32, %arg1: i32) -> (i32, i32) {
    %c0_i32 = arith.constant 0 : i32
    %c0_i32_0 = arith.constant 0 : i32
    %c0_i32_1 = arith.constant 0 : i32
    return %c0_i32, %c0_i32_0 : i32, i32
  }
  func.func @transform_9(%arg0: i32, %arg1: i32) -> (i32, i32) {
    %c0_i32 = arith.constant 0 : i32
    %c0_i32_0 = arith.constant 0 : i32
    return %arg0, %c0_i32 : i32, i32
  }
}

module attributes {stable_mosaic.version = 11 : i64} {
  func.func @pgcn_kernel(%arg0: i32, %arg1: i32, %arg2: memref<2x64x196xf32, #tpu.memory_space<vmem>>, %arg3: memref<64x32xf32, #tpu.memory_space<vmem>>, %arg4: memref<1x32xf32, #tpu.memory_space<vmem>>, %arg5: memref<32x128xf32, #tpu.memory_space<vmem>>, %arg6: memref<1x128xf32, #tpu.memory_space<vmem>>, %arg7: memref<128x128xf32, #tpu.memory_space<vmem>>, %arg8: memref<1x128xf32, #tpu.memory_space<vmem>>, %arg9: memref<32x32xf32, #tpu.memory_space<vmem>>, %arg10: memref<1x32xf32, #tpu.memory_space<vmem>>, %arg11: memref<2x128xf32, #tpu.memory_space<vmem>>, %arg12: memref<2x32xf32, #tpu.memory_space<vmem>>) attributes {dimension_semantics = [#tpu.dimension_semantics<arbitrary>, #tpu.dimension_semantics<arbitrary>], iteration_bounds = array<i64: 1, 1>, scalar_prefetch = 0 : i64, scratch_operands = 1 : i64, tpu.core_type = #tpu.core_type<tc>, window_params = [{transform_indices = @transform_0, window_bounds = array<i64: 2, 64, 196>}, {transform_indices = @transform_1, window_bounds = array<i64: 64, 32>}, {pipeline_mode = #tpu.pipeline_mode<synchronous>, transform_indices = @transform_2, window_bounds = array<i64: 1, 32>}, {pipeline_mode = #tpu.pipeline_mode<synchronous>, transform_indices = @transform_3, window_bounds = array<i64: 32, 128>}, {pipeline_mode = #tpu.pipeline_mode<synchronous>, transform_indices = @transform_4, window_bounds = array<i64: 1, 128>}, {pipeline_mode = #tpu.pipeline_mode<synchronous>, transform_indices = @transform_5, window_bounds = array<i64: 128, 128>}, {pipeline_mode = #tpu.pipeline_mode<synchronous>, transform_indices = @transform_6, window_bounds = array<i64: 1, 128>}, {pipeline_mode = #tpu.pipeline_mode<synchronous>, transform_indices = @transform_7, window_bounds = array<i64: 32, 32>}, {pipeline_mode = #tpu.pipeline_mode<synchronous>, transform_indices = @transform_8, window_bounds = array<i64: 1, 32>}, {transform_indices = @transform_9, window_bounds = array<i64: 2, 128>}]} {
    %c0_i32 = arith.constant 0 : i32
    %0 = arith.cmpi eq, %arg1, %c0_i32 : i32
    %1 = arith.extui %0 : i1 to i32
    %c0_i32_0 = arith.constant 0 : i32
    %2 = arith.cmpi ne, %1, %c0_i32_0 : i32
    scf.if %2 {
      %cst_12 = arith.constant 0.000000e+00 : f32
      %13 = vector.broadcast %cst_12 : f32 to vector<2x32xf32>
      %c0_13 = arith.constant 0 : index
      %c0_14 = arith.constant 0 : index
      %14 = vector.load %arg12[%c0_13, %c0_14] : memref<2x32xf32, #tpu.memory_space<vmem>>, vector<2x32xf32>
      tpu.vector_store %arg12[%c0_13, %c0_14], %13 {strides = array<i32>} : memref<2x32xf32, #tpu.memory_space<vmem>>, vector<2x32xf32>,
    } else {
    }
    %c0 = arith.constant 0 : index
    %c0_1 = arith.constant 0 : index
    %c0_2 = arith.constant 0 : index
    %3 = vector.load %arg2[%c0, %c0_1, %c0_2] : memref<2x64x196xf32, #tpu.memory_space<vmem>>, vector<2x64x196xf32>
    %cst = arith.constant dense<0xFF800000> : vector<2x64xf32>
    %4 = vector.multi_reduction <maximumf>, %3, %cst [2] : vector<2x64x196xf32> to vector<2x64xf32>
    %c0_3 = arith.constant 0 : index
    %c0_4 = arith.constant 0 : index
    %5 = vector.load %arg12[%c0_3, %c0_4] : memref<2x32xf32, #tpu.memory_space<vmem>>, vector<2x32xf32>
    %c0_5 = arith.constant 0 : index
    %c0_6 = arith.constant 0 : index
    %6 = vector.load %arg3[%c0_5, %c0_6] : memref<64x32xf32, #tpu.memory_space<vmem>>, vector<64x32xf32>
    %cst_7 = arith.constant dense<0.000000e+00> : vector<2x32xf32>
    %7 = tpu.matmul %4, %6, %cst_7 {dimension_numbers = #tpu.dot_dimension_numbers<[1], [0], [0], [1], [0, 0, 1, 1], [], []>} : vector<2x64xf32>, vector<64x32xf32>, vector<2x32xf32> -> vector<2x32xf32>
    %8 = arith.addf %5, %7 : vector<2x32xf32>
    %c0_8 = arith.constant 0 : index
    %c0_9 = arith.constant 0 : index
    %9 = vector.load %arg12[%c0_8, %c0_9] : memref<2x32xf32, #tpu.memory_space<vmem>>, vector<2x32xf32>
    tpu.vector_store %arg12[%c0_8, %c0_9], %8 {strides = array<i32>} : memref<2x32xf32, #tpu.memory_space<vmem>>, vector<2x32xf32>,
    %c0_i32_10 = arith.constant 0 : i32
    %10 = arith.cmpi eq, %arg1, %c0_i32_10 : i32
    %11 = arith.extui %10 : i1 to i32
    %c0_i32_11 = arith.constant 0 : i32
    %12 = arith.cmpi ne, %11, %c0_i32_11 : i32
    scf.if %12 {
      %c0_12 = arith.constant 0 : index
      %c0_13 = arith.constant 0 : index
      %13 = vector.load %arg12[%c0_12, %c0_13] : memref<2x32xf32, #tpu.memory_space<vmem>>, vector<2x32xf32>
      %c0_14 = arith.constant 0 : index
      %c0_15 = arith.constant 0 : index
      %14 = vector.load %arg4[%c0_14, %c0_15] : memref<1x32xf32, #tpu.memory_space<vmem>>, vector<1x32xf32>
      %15 = vector.broadcast %14 : vector<1x32xf32> to vector<2x32xf32>
      %16 = arith.addf %13, %15 : vector<2x32xf32>
      %c0_16 = arith.constant 0 : index
      %c0_17 = arith.constant 0 : index
      %17 = vector.load %arg5[%c0_16, %c0_17] : memref<32x128xf32, #tpu.memory_space<vmem>>, vector<32x128xf32>
      %cst_18 = arith.constant dense<0.000000e+00> : vector<2x128xf32>
      %18 = tpu.matmul %16, %17, %cst_18 {dimension_numbers = #tpu.dot_dimension_numbers<[1], [0], [0], [1], [0, 0, 1, 1], [], []>} : vector<2x32xf32>, vector<32x128xf32>, vector<2x128xf32> -> vector<2x128xf32>
      %c0_19 = arith.constant 0 : index
      %c0_20 = arith.constant 0 : index
      %19 = vector.load %arg6[%c0_19, %c0_20] : memref<1x128xf32, #tpu.memory_space<vmem>>, vector<1x128xf32>
      %20 = vector.broadcast %19 : vector<1x128xf32> to vector<2x128xf32>
      %21 = arith.addf %18, %20 : vector<2x128xf32>
      %c0_21 = arith.constant 0 : index
      %c0_22 = arith.constant 0 : index
      %22 = vector.load %arg9[%c0_21, %c0_22] : memref<32x32xf32, #tpu.memory_space<vmem>>, vector<32x32xf32>
      %cst_23 = arith.constant dense<0.000000e+00> : vector<2x32xf32>
      %23 = tpu.matmul %16, %22, %cst_23 {dimension_numbers = #tpu.dot_dimension_numbers<[1], [0], [0], [1], [0, 0, 1, 1], [], []>} : vector<2x32xf32>, vector<32x32xf32>, vector<2x32xf32> -> vector<2x32xf32>
      %c0_24 = arith.constant 0 : index
      %c0_25 = arith.constant 0 : index
      %24 = vector.load %arg10[%c0_24, %c0_25] : memref<1x32xf32, #tpu.memory_space<vmem>>, vector<1x32xf32>
      %cst_26 = arith.constant 2.000000e-01 : f32
      %25 = vector.broadcast %cst_26 : f32 to vector<2x32xf32>
      %26 = arith.mulf %25, %23 : vector<2x32xf32>
      %27 = arith.maximumf %23, %26 : vector<2x32xf32>
      %28 = vector.broadcast %24 : vector<1x32xf32> to vector<2x32xf32>
      %29 = arith.mulf %27, %28 : vector<2x32xf32>
      %cst_27 = arith.constant dense<0.000000e+00> : vector<2xf32>
      %30 = vector.multi_reduction <add>, %29, %cst_27 [1] : vector<2x32xf32> to vector<2xf32>
      %31 = vector.shape_cast %30 : vector<2xf32> to vector<2x1xf32>
      %cst_28 = arith.constant 2.000000e-01 : f32
      %32 = vector.broadcast %cst_28 : f32 to vector<2x32xf32>
      %33 = arith.mulf %32, %23 : vector<2x32xf32>
      %34 = arith.minimumf %23, %33 : vector<2x32xf32>
      %35 = vector.broadcast %24 : vector<1x32xf32> to vector<2x32xf32>
      %36 = arith.mulf %34, %35 : vector<2x32xf32>
      %cst_29 = arith.constant dense<0.000000e+00> : vector<2xf32>
      %37 = vector.multi_reduction <add>, %36, %cst_29 [1] : vector<2x32xf32> to vector<2xf32>
      %38 = vector.shape_cast %37 : vector<2xf32> to vector<2x1xf32>
      %c0_30 = arith.constant 0 : index
      %c0_31 = arith.constant 0 : index
      %39 = vector.load %arg8[%c0_30, %c0_31] : memref<1x128xf32, #tpu.memory_space<vmem>>, vector<1x128xf32>
      %cst_32 = arith.constant 0.000000e+00 : f32
      %40 = vector.broadcast %cst_32 : f32 to vector<1x128xf32>
      %41 = arith.cmpf oge, %39, %40 : vector<1x128xf32>
      %42 = vector.broadcast %39 : vector<1x128xf32> to vector<2x128xf32>
      %43 = vector.broadcast %31 : vector<2x1xf32> to vector<2x128xf32>
      %44 = arith.mulf %42, %43 : vector<2x128xf32>
      %45 = vector.broadcast %39 : vector<1x128xf32> to vector<2x128xf32>
      %46 = vector.broadcast %38 : vector<2x1xf32> to vector<2x128xf32>
      %47 = arith.mulf %45, %46 : vector<2x128xf32>
      %48 = vector.shape_cast %41 : vector<1x128xi1> to vector<1x128xi1>
      %49 = vector.broadcast %48 : vector<1x128xi1> to vector<2x128xi1>
      %50 = arith.select %49, %44, %47 : vector<2x128xi1>, vector<2x128xf32>
      %c0_33 = arith.constant 0 : index
      %c0_34 = arith.constant 0 : index
      %51 = vector.load %arg7[%c0_33, %c0_34] : memref<128x128xf32, #tpu.memory_space<vmem>>, vector<128x128xf32>
      %cst_35 = arith.constant dense<0.000000e+00> : vector<2x128xf32>
      %52 = tpu.matmul %50, %51, %cst_35 {dimension_numbers = #tpu.dot_dimension_numbers<[1], [0], [0], [1], [0, 0, 1, 1], [], []>} : vector<2x128xf32>, vector<128x128xf32>, vector<2x128xf32> -> vector<2x128xf32>
      %53 = arith.addf %52, %21 : vector<2x128xf32>
      %c0_36 = arith.constant 0 : index
      %c0_37 = arith.constant 0 : index
      %54 = vector.load %arg11[%c0_36, %c0_37] : memref<2x128xf32, #tpu.memory_space<vmem>>, vector<2x128xf32>
      tpu.vector_store %arg11[%c0_36, %c0_37], %53 {strides = array<i32>} : memref<2x128xf32, #tpu.memory_space<vmem>>, vector<2x128xf32>,
    } else {
    }
    return
  }
  func.func @transform_0(%arg0: i32, %arg1: i32) -> (i32, i32, i32) {
    %c0_i32 = arith.constant 0 : i32
    %c0_i32_0 = arith.constant 0 : i32
    return %arg0, %arg1, %c0_i32 : i32, i32, i32
  }
  func.func @transform_1(%arg0: i32, %arg1: i32) -> (i32, i32) {
    %c0_i32 = arith.constant 0 : i32
    %c0_i32_0 = arith.constant 0 : i32
    return %arg1, %c0_i32 : i32, i32
  }
  func.func @transform_2(%arg0: i32, %arg1: i32) -> (i32, i32) {
    %c0_i32 = arith.constant 0 : i32
    %c0_i32_0 = arith.constant 0 : i32
    %c0_i32_1 = arith.constant 0 : i32
    return %c0_i32, %c0_i32_0 : i32, i32
  }
  func.func @transform_3(%arg0: i32, %arg1: i32) -> (i32, i32) {
    %c0_i32 = arith.constant 0 : i32
    %c0_i32_0 = arith.constant 0 : i32
    %c0_i32_1 = arith.constant 0 : i32
    return %c0_i32, %c0_i32_0 : i32, i32
  }
  func.func @transform_4(%arg0: i32, %arg1: i32) -> (i32, i32) {
    %c0_i32 = arith.constant 0 : i32
    %c0_i32_0 = arith.constant 0 : i32
    %c0_i32_1 = arith.constant 0 : i32
    return %c0_i32, %c0_i32_0 : i32, i32
  }
  func.func @transform_5(%arg0: i32, %arg1: i32) -> (i32, i32) {
    %c0_i32 = arith.constant 0 : i32
    %c0_i32_0 = arith.constant 0 : i32
    %c0_i32_1 = arith.constant 0 : i32
    return %c0_i32, %c0_i32_0 : i32, i32
  }
  func.func @transform_6(%arg0: i32, %arg1: i32) -> (i32, i32) {
    %c0_i32 = arith.constant 0 : i32
    %c0_i32_0 = arith.constant 0 : i32
    %c0_i32_1 = arith.constant 0 : i32
    return %c0_i32, %c0_i32_0 : i32, i32
  }
  func.func @transform_7(%arg0: i32, %arg1: i32) -> (i32, i32) {
    %c0_i32 = arith.constant 0 : i32
    %c0_i32_0 = arith.constant 0 : i32
    %c0_i32_1 = arith.constant 0 : i32
    return %c0_i32, %c0_i32_0 : i32, i32
  }
  func.func @transform_8(%arg0: i32, %arg1: i32) -> (i32, i32) {
    %c0_i32 = arith.constant 0 : i32
    %c0_i32_0 = arith.constant 0 : i32
    %c0_i32_1 = arith.constant 0 : i32
    return %c0_i32, %c0_i32_0 : i32, i32
  }
  func.func @transform_9(%arg0: i32, %arg1: i32) -> (i32, i32) {
    %c0_i32 = arith.constant 0 : i32
    %c0_i32_0 = arith.constant 0 : i32
    return %arg0, %c0_i32 : i32, i32
  }
}

</mosaic_0001>

<bundles_post_ra>
// kernel: tpu_custom_call.1
= control target key start
LH: loop header
LB: loop body
LE: loop exit
PB: predicated region body
PF: predicated region fallthrough
CT: control target
= control target key end

     0   :  { %14 = vsyncpa [#allocation4], 0  ;;  %s1144_s0 = inlined_call_operand.hbm [shape: f32[2,64,196], index: 0, kind: input, shape index: {}]   ;;  %s1145_s1 = inlined_call_operand.vmem [shape: f32[64,32], index: 1, kind: input, shape index: {}]   ;;  %s1146_s2 = inlined_call_operand.vmem [shape: f32[1,32], index: 2, kind: input, shape index: {}]   ;;  %s1147_s3 = inlined_call_operand.vmem [shape: f32[32,128], index: 3, kind: input, shape index: {}]   ;;  %s1148_s4 = inlined_call_operand.vmem [shape: f32[1,128], index: 4, kind: input, shape index: {}]   ;;  %s1149_s5 = inlined_call_operand.hbm [shape: f32[128,128], index: 5, kind: input, shape index: {}]   ;;  %s1150_s6 = inlined_call_operand.vmem [shape: f32[1,128], index: 6, kind: input, shape index: {}]   ;;  %s1151_s7 = inlined_call_operand.vmem [shape: f32[32,32], index: 7, kind: input, shape index: {}]   ;;  %s1152_s8 = inlined_call_operand.vmem [shape: f32[1,32], index: 8, kind: input, shape index: {}]   ;;  %s1153_s9 = inlined_call_operand.hbm [shape: f32[2,128], index: 9, kind: output, shape index: {}]  }
   0x1   :  { %15 = vsyncpa [#allocation7], 0 }
   0x2   :  { %16 = vsyncpa [#allocation5], 0  ;;  %s921_s30 = smov [#allocation3]   ;;  %s849_s13 = scalar_lea.hbm %s1144_s0, 4096 }
   0x3   :  { %s22_s10 = sshll.u32 %s921_s30, 4  ;;  %p850_p0 = scmp.ne.s32.totalorder %s1144_s0, %s849_s13  ;;  %s23_s10 = int_to_ptr.vmem [resolvable:$true] %s22_s10 }
   0x4   :  { %p853_p1 = scmp.lt.u32.totalorder %s849_s13, %s1144_s0 }
   0x6   :  { %p855_p2 = pnand %p853_p1, %p850_p0 }
   0x8   :  { %858 = shalt.err (!%p855_p2)
}
   0x9   :  { %s859_s18 = scalar_lea.vmem %s23_s10, 4096  ;;  %p864_p4 = scmp.lt.s32.totalorder %s23_s10, %s23_s10 }
   0xa   :  { %p860_p3 = scmp.ne.s32.totalorder %s23_s10, %s859_s18  ;;  %p865_p5 = scmp.lt.s32.totalorder %s859_s18, %s859_s18 }
   0xc   :  { %p866_p6 = por %p865_p5, %p864_p4 }
   0xe   :  { %p867_p7 = pnand %p866_p6, %p860_p3 }
  0x10   :  { %870 = shalt.err (!%p867_p7)
}
  0x11   :  { %s922_s19 = smov 256   ;;  %s923_s20 = smov 16  }
  0x12   :  { %28 = dma.hbm_to_vmem [thread:$0]  %s1144_s0, 4096, %s23_s10, [#allocation4], %s922_s19, %s922_s19, %s923_s20  }
  0x13   :  { %s924_s23 = smov [#allocation6]   ;;  %s871_s27 = scalar_lea.hbm %s1149_s5, 2048 }
  0x14   :  { %s42_s24 = sshll.u32 %s924_s23, 4  ;;  %p872_p8 = scmp.ne.s32.totalorder %s1149_s5, %s871_s27  ;;  %s43_s24 = int_to_ptr.vmem [resolvable:$true] %s42_s24 }
  0x15   :  { %p875_p9 = scmp.lt.u32.totalorder %s871_s27, %s1149_s5 }
  0x17   :  { %p877_p10 = pnand %p875_p9, %p872_p8 }
  0x19   :  { %880 = shalt.err (!%p877_p10)
}
  0x1a   :  { %s881_s12 = scalar_lea.vmem %s43_s24, 2048  ;;  %p886_p12 = scmp.lt.s32.totalorder %s43_s24, %s43_s24 }
  0x1b   :  { %p882_p11 = scmp.ne.s32.totalorder %s43_s24, %s881_s12  ;;  %p887_p13 = scmp.lt.s32.totalorder %s881_s12, %s881_s12 }
  0x1d   :  { %p888_p0 = por %p887_p13, %p886_p12 }
  0x1f   :  { %p889_p1 = pnand %p888_p0, %p882_p11 }
  0x21   :  { %892 = shalt.err (!%p889_p1)
}
  0x22   :  { %s925_s0 = smov 128   ;;  %s926_s10 = smov 8  }
  0x23   :  { %48 = dma.hbm_to_vmem [thread:$0]  %s1149_s5, 2048, %s43_s24, [#allocation7], %s925_s0, %s925_s0, %s926_s10  }
  0x24   :  { %915 = dma.done.wait [#allocation4], 4096  }
  0x25   :  { %916 = vsyncadd [#allocation4], 4294963200 }
  0x26   :  { %917 = dma.done.wait [#allocation7], 2048  }
  0x27   :  { %918 = vsyncadd [#allocation7], 4294965248  ;;  %vm99_vm0 = vcmask 556032   ;;  %v83_v0 = vld [vmem:[#allocation3 + $0x80] sm:$0xff]  ;;  %v84_v1 = vld [vmem:[#allocation3 + $0x88] sm:$0xff]  ;;  %vm65_vm1 = vcmask 254976  }
  0x28   :  { %v67_v2 = vld [vmem:[#allocation3] sm:$0xff]  ;;  %v132_v3 = vsel %vm99_vm0, %v84_v1, -inf  ;;  %v68_v4 = vld [vmem:[#allocation3 + $0x8] sm:$0xff]  ;;  %v85_v5 = vld [vmem:[#allocation3 + $0x90] sm:$0xff]  ;;  %vm929_vm2 = vmmov 0   ;;  %vm200_vm3 = vcmask 130112  }
  0x29   :  { %v86_v6 = vld [vmem:[#allocation3 + $0x98] sm:$0xff]  ;;  %v133_v7 = vmax.f32 %v83_v0, %v132_v3  ;;  %v100_v8 = vsel %vm99_vm0, %v68_v4, -inf  ;;  %v69_v10 = vld [vmem:[#allocation3 + $0x10] sm:$0xff]  ;;  %v88_v14 = vld [vmem:[#allocation3 + $0xa8] sm:$0xff]  ;;  %v927_v3 = vmov 0.0|0.0   ;;  %vm207_vm4 = vcmask 195712  }
  0x2a   :  { %v136_v9 = vsel %vm99_vm0, %v86_v6, -inf  ;;  %v70_v11 = vld [vmem:[#allocation3 + $0x18] sm:$0xff]  ;;  %v101_v12 = vmax.f32 %v67_v2, %v100_v8  ;;  %v72_v15 = vld [vmem:[#allocation3 + $0x28] sm:$0xff]  ;;  %v87_v18 = vld [vmem:[#allocation3 + $0xa0] sm:$0xff]  ;;  %v140_v19 = vsel %vm99_vm0, %v88_v14, -inf  ;;  %788 = vmatprep.subr.bf16.mxu0 %v927_v3  ;;  %812 = vmatprep.subr.bf16.mxu1 %v927_v3  ;;  %vm214_vm5 = vcmask 261312  }
  0x2b   :  { %v104_v13 = vsel %vm99_vm0, %v70_v11, -inf  ;;  %134 = vmax.xlane.f32.xlu1 %v133_v7  ;;  %v137_v16 = vmax.f32 %v85_v5, %v136_v9  ;;  %v71_v20 = vld [vmem:[#allocation3 + $0x20] sm:$0xff]  ;;  %v108_v21 = vsel %vm99_vm0, %v72_v15, -inf  ;;  %v90_v22 = vld [vmem:[#allocation3 + $0xb8] sm:$0xff]  ;;  %v141_v24 = vmax.f32 %v87_v18, %v140_v19  ;;  %v89_v26 = vld [vmem:[#allocation3 + $0xb0] sm:$0xff]  ;;  %s931_s26 = smov [#allocation8]  }
  0x2c   :  { %102 = vmax.xlane.f32.xlu0 %v101_v12  ;;  %v105_v17 = vmax.f32 %v69_v10, %v104_v13  ;;  %v74_v23 = vld [vmem:[#allocation3 + $0x38] sm:$0xff]  ;;  %v109_v25 = vmax.f32 %v71_v20, %v108_v21  ;;  %v144_v27 = vsel %vm99_vm0, %v90_v22, -inf  ;;  %v73_v28 = vld [vmem:[#allocation3 + $0x30] sm:$0xff]  ;;  %v92_v30 = vld [vmem:[#allocation3 + $0xc8] sm:$0xff]  ;;  %v928_v13 = vmov 0.0  }
  0x2d   :  { %v112_v29 = vsel %vm99_vm0, %v74_v23, -inf  ;;  %v76_v31 = vld [vmem:[#allocation3 + $0x48] sm:$0xff]  ;;  %v145_v32 = vmax.f32 %v89_v26, %v144_v27  ;;  %v91_v34 = vld [vmem:[#allocation3 + $0xc0] sm:$0xff]  ;;  %v148_v35 = vsel %vm99_vm0, %v92_v30, -inf  ;;  %v94_v38 = vld [vmem:[#allocation3 + $0xd8] sm:$0xff]  ;;  %728 = vmatprep.mubr.msk.f32.mxu0 %vm929_vm2, %v928_v13  ;;  %785 = vmatprep.mubr.msk.f32.mxu1 %vm929_vm2, %v928_v13  ;;  %v189_v18 = vlaneseq }
  0x2e   :  { %v113_v33 = vmax.f32 %v73_v28, %v112_v29  ;;  %v75_v36 = vld [vmem:[#allocation3 + $0x40] sm:$0xff]  ;;  %v116_v37 = vsel %vm99_vm0, %v76_v31, -inf  ;;  %v78_v39 = vld [vmem:[#allocation3 + $0x58] sm:$0xff]  ;;  %v149_v40 = vmax.f32 %v91_v34, %v148_v35  ;;  %v93_v42 = vld [vmem:[#allocation3 + $0xd0] sm:$0xff]  ;;  %v152_v43 = vsel %vm99_vm0, %v94_v38, -inf }
  0x2f   :  { %138 = vmax.xlane.f32.xlu1 %v137_v16  ;;  %v117_v41 = vmax.f32 %v75_v36, %v116_v37  ;;  %v77_v44 = vld [vmem:[#allocation3 + $0x50] sm:$0xff]  ;;  %v120_v45 = vsel %vm99_vm0, %v78_v39, -inf  ;;  %v96_v46 = vld [vmem:[#allocation3 + $0xe8] sm:$0xff]  ;;  %v153_v48 = vmax.f32 %v93_v42, %v152_v43  ;;  %v95_v50 = vld [vmem:[#allocation3 + $0xe0] sm:$0xff]  ;;  %66 = vst.msk [vmem:[#allocation2] sm:$0x3] %vm65_vm1, %v928_v13 }
  0x30   :  { %106 = vmax.xlane.f32.xlu0 %v105_v17  ;;  %v80_v47 = vld [vmem:[#allocation3 + $0x68] sm:$0xff]  ;;  %v121_v49 = vmax.f32 %v77_v44, %v120_v45  ;;  %v156_v51 = vsel %vm99_vm0, %v96_v46, -inf  ;;  %v79_v52 = vld [vmem:[#allocation3 + $0x60] sm:$0xff]  ;;  %v98_v54 = vld [vmem:[#allocation3 + $0xf8] sm:$0xff]  ;;  %v190_v21 = vand.u32 127, %v189_v18  ;;  %v1058_v26 = vshrl.u32 %v189_v18, 7 }
  0x31   :  { %v124_v53 = vsel %vm99_vm0, %v80_v47, -inf  ;;  %v82_v55 = vld [vmem:[#allocation3 + $0x78] sm:$0xff]  ;;  %v157_v56 = vmax.f32 %v95_v50, %v156_v51  ;;  %v97_v58 = vld [vmem:[#allocation3 + $0xf0] sm:$0xff]  ;;  %v160_v59 = vsel %vm99_vm0, %v98_v54, -inf  ;;  %v166_v1 = vld [vmem:[%s1145_s1 + $0x8] sm:$0xff]  ;;  %vm221_vm6 = vcmask 326912  }
  0x32   :  { %v125_v57 = vmax.f32 %v79_v52, %v124_v53  ;;  %v81_v60 = vld [vmem:[#allocation3 + $0x70] sm:$0xff]  ;;  %v128_v61 = vsel %vm99_vm0, %v82_v55, -inf  ;;  %v161_v62 = vmax.f32 %v97_v58, %v160_v59  ;;  %v165_v0 = vld [vmem:[%s1145_s1] sm:$0xff]  ;;  %v170_v8 = vld [vmem:[%s1145_s1 + $0x28] sm:$0xff]  ;;  %v195_v23 = vadd.s32 4294967288, %v190_v21 }
  0x33   :  { %142 = vmax.xlane.f32.xlu1 %v141_v24  ;;  %v129_v63 = vmax.f32 %v81_v60, %v128_v61  ;;  %v789_v2 = vpack.c.bf16 %v166_v1, %v165_v0  ;;  %v167_v4 = vld [vmem:[%s1145_s1 + $0x10] sm:$0xff]  ;;  %v168_v5 = vld [vmem:[%s1145_s1 + $0x18] sm:$0xff]  ;;  %v169_v7 = vld [vmem:[%s1145_s1 + $0x20] sm:$0xff]  ;;  %v209_v27 = vadd.s32 4294967272, %v190_v21  ;;  %v216_v28 = vadd.s32 4294967264, %v190_v21 }
  0x34   :  { %110 = vmax.xlane.f32.xlu0 %v109_v25  ;;  %v792_v6 = vpack.c.bf16 %v168_v5, %v167_v4  ;;  %v795_v9 = vpack.c.bf16 %v170_v8, %v169_v7  ;;  %v171_v10 = vld [vmem:[%s1145_s1 + $0x30] sm:$0xff]  ;;  %v172_v11 = vld [vmem:[%s1145_s1 + $0x38] sm:$0xff]  ;;  %v202_v25 = vadd.s32 4294967280, %v190_v21  ;;  %v198_v30 = vsub.s32 %v195_v23, %v1058_v26  ;;  %v374_v18 = vld [vmem:[%s1147_s3 + $0x8] sm:$0xff] }
  0x35   :  { %790 = vmatpush3.bf16.msra.mxu0 %v789_v2  ;;  %v798_v12 = vpack.c.bf16 %v172_v11, %v171_v10  ;;  %v230_v34 = vadd.s32 4294967248, %v190_v21  ;;  %v193_v35 = vsub.s32 %v190_v21, %v1058_v26  ;;  %v212_v36 = vsub.s32 %v209_v27, %v1058_v26 }
  0x36   :  { %791 = vmatprep.subr.bf16.mxu0 %v927_v3  ;;  %v219_v37 = vsub.s32 %v216_v28, %v1058_v26  ;;  %v237_v42 = vadd.s32 4294967240, %v190_v21  ;;  %vm228_vm7 = vcmask 392512   ;;  %vm235_vm8 = vcmask 458112   ;;  %v164_v23 = vld [vmem:[#allocation2] sm:$0x3] }
  0x37   :  { %146 = vmax.xlane.f32.xlu1 %v145_v32  ;;  %v223_v32 = vadd.s32 4294967256, %v190_v21  ;;  %v233_v45 = vsub.s32 %v230_v34, %v1058_v26  ;;  %vm242_vm9 = vcmask 523712   ;;  %vm283_vm10 = vcmask 1041409   ;;  %v376_v21 = vld [vmem:[%s1147_s3 + $0x18] sm:$0xff]  ;;  %v458_v28 = vld [vmem:[%s1151_s7] sm:$0xff]  ;;  %v460_v34 = vld [vmem:[%s1151_s7 + $0x10] sm:$0xff] }
  0x38   :  { %114 = vmax.xlane.f32.xlu0 %v113_v33  ;;  %v205_v33 = vsub.s32 %v202_v25, %v1058_v26  ;;  %vm285_vm11 = vcmask 523264   ;;  %vm384_vm12 = vcmask 261120  }
  0x39   :  { %793 = vmatpush3.bf16.msra.mxu0 %v792_v6 }
  0x3a   :  { %794 = vmatprep.subr.bf16.mxu0 %v927_v3 }
  0x3b   :  { %150 = vmax.xlane.f32.xlu1 %v149_v40  ;;  %v226_v40 = vsub.s32 %v223_v32, %v1058_v26 }
  0x3c   :  { %118 = vmax.xlane.f32.xlu0 %v117_v41 }
  0x3d   :  { %796 = vmatpush3.bf16.msra.mxu0 %v795_v9 }
  0x3e   :  { %797 = vmatprep.subr.bf16.mxu0 %v927_v3 }
  0x3f   :  { %154 = vmax.xlane.f32.xlu1 %v153_v48 }
  0x40   :  { %122 = vmax.xlane.f32.xlu0 %v121_v49 }
  0x41   :  { %799 = vmatpush3.bf16.msra.mxu0 %v798_v12 }
  0x42   :  { %800 = vmatprep.subr.bf16.mxu0 %v927_v3 }
  0x43   :  { %158 = vmax.xlane.f32.xlu1 %v157_v56 }
  0x44   :  { %126 = vmax.xlane.f32.xlu0 %v125_v57  ;;  %v240_v57 = vsub.s32 %v237_v42, %v1058_v26 }
  0x47   :  { %162 = vmax.xlane.f32.xlu1 %v161_v62 }
  0x48   :  { %130 = vmax.xlane.f32.xlu0 %v129_v63 }
  0xb8   :  { %v135_v14 = vpop.xlane.xlu1 %134 }
  0xb9   :  { %v103_v15 = vpop.xlane.xlu0 %102  ;;  %v247_v46 = vrot.slane %v135_v14, %v193_v35 }
  0xba   :  { %v194_v49 = vrot.slane %v103_v15, %v193_v35  ;;  %v461_v35 = vld [vmem:[%s1151_s7 + $0x18] sm:$0xff] }
  0xbc   :  { %v139_v16 = vpop.xlane.xlu1 %138 }
  0xbd   :  { %v107_v17 = vpop.xlane.xlu0 %106  ;;  %v251_v39 = vrot.slane %v139_v16, %v198_v30 }
  0xbe   :  { %v199_v43 = vrot.slane %v107_v17, %v198_v30  ;;  %v373_v17 = vld [vmem:[%s1147_s3] sm:$0xff] }
  0xbf   :  { %v252_v53 = vsel %vm200_vm3, %v251_v39, %v247_v46  ;;  %v671_v30 = vld [vmem:[%s1146_s2] ss:$0 sm:$0xff]  ;;  %v569_v39 = vld [vmem:[#allocation6 + $0x10] sm:$0xff] }
  0xc0   :  { %v143_v19 = vpop.xlane.xlu1 %142  ;;  %v201_v58 = vsel %vm200_vm3, %v199_v43, %v194_v49  ;;  %v571_v43 = vld [vmem:[#allocation6 + $0x20] sm:$0xff]  ;;  %v574_v46 = vld [vmem:[#allocation6 + $0x38] sm:$0xff]  ;;  %v576_v49 = vld [vmem:[#allocation6 + $0x48] sm:$0xff] }
  0xc1   :  { %v111_v20 = vpop.xlane.xlu0 %110  ;;  %v256_v44 = vrot.slane %v143_v19, %v205_v33  ;;  %v801_v19 = vpack.c.bf16 %v374_v18, %v373_v17 }
  0xc2   :  { %v206_v47 = vrot.slane %v111_v20, %v205_v33  ;;  %v375_v20 = vld [vmem:[%s1147_s3 + $0x10] sm:$0xff] }
  0xc3   :  { %v257_v59 = vsel %vm207_vm4, %v256_v44, %v252_v53  ;;  %v572_v44 = vld [vmem:[#allocation6 + $0x28] sm:$0xff] }
  0xc4   :  { %v147_v22 = vpop.xlane.xlu1 %146  ;;  %v208_v62 = vsel %vm207_vm4, %v206_v47, %v201_v58 }
  0xc5   :  { %v115_v24 = vpop.xlane.xlu0 %114  ;;  %v261_v48 = vrot.slane %v147_v22, %v212_v36  ;;  %v804_v22 = vpack.c.bf16 %v376_v21, %v375_v20  ;;  %v672_v20 = vld [vmem:[%s1148_s4] ss:$0 sm:$0xff] }
  0xc6   :  { %v213_v50 = vrot.slane %v115_v24, %v212_v36  ;;  %v810_v36 = vpack.c.bf16 %v461_v35, %v460_v34 }
  0xc7   :  { %v262_v63 = vsel %vm214_vm5, %v261_v48, %v257_v59  ;;  %v575_v48 = vld [vmem:[#allocation6 + $0x40] sm:$0xff] }
  0xc8   :  { %v151_v29 = vpop.xlane.xlu1 %150  ;;  %v215_v1 = vsel %vm214_vm5, %v213_v50, %v208_v62  ;;  %v825_v50 = vpack.c.bf16 %v576_v49, %v575_v48  ;;  %v675_v62 = vld [vmem:[%s1152_s8] ss:$0 sm:$0xff] }
  0xc9   :  { %v119_v31 = vpop.xlane.xlu0 %118  ;;  %v266_v51 = vrot.slane %v151_v29, %v219_v37  ;;  %v459_v29 = vld [vmem:[%s1151_s7 + $0x8] sm:$0xff] }
  0xca   :  { %v220_v54 = vrot.slane %v119_v31, %v219_v37  ;;  %v807_v32 = vpack.c.bf16 %v459_v29, %v458_v28  ;;  %v567_v37 = vld [vmem:[#allocation6] sm:$0xff] }
  0xcb   :  { %v267_v2 = vsel %vm221_vm6, %v266_v51, %v262_v63  ;;  %v577_v51 = vld [vmem:[#allocation6 + $0x50] sm:$0xff] }
  0xcc   :  { %v155_v38 = vpop.xlane.xlu1 %154  ;;  %v222_v5 = vsel %vm221_vm6, %v220_v54, %v215_v1  ;;  %v579_v54 = vld [vmem:[#allocation6 + $0x60] sm:$0xff] }
  0xcd   :  { %v123_v41 = vpop.xlane.xlu0 %122  ;;  %v271_v55 = vrot.slane %v155_v38, %v226_v40  ;;  %v568_v38 = vld [vmem:[#allocation6 + $0x8] sm:$0xff] }
  0xce   :  { %v227_v60 = vrot.slane %v123_v41, %v226_v40  ;;  %v813_v40 = vpack.c.bf16 %v568_v38, %v567_v37  ;;  %v570_v41 = vld [vmem:[#allocation6 + $0x18] sm:$0xff] }
  0xcf   :  { %v272_v6 = vsel %vm228_vm7, %v271_v55, %v267_v2  ;;  %v816_v42 = vpack.c.bf16 %v570_v41, %v569_v39  ;;  %v580_v55 = vld [vmem:[#allocation6 + $0x68] sm:$0xff] }
  0xd0   :  { %v159_v52 = vpop.xlane.xlu1 %158  ;;  %v229_v9 = vsel %vm228_vm7, %v227_v60, %v222_v5  ;;  %814 = vmatpush3.bf16.msra.mxu1 %v813_v40 }
  0xd1   :  { %v127_v56 = vpop.xlane.xlu0 %126  ;;  %v276_v61 = vrot.slane %v159_v52, %v233_v45  ;;  %815 = vmatprep.subr.bf16.mxu1 %v927_v3  ;;  %v578_v52 = vld [vmem:[#allocation6 + $0x58] sm:$0xff] }
  0xd2   :  { %v234_v0 = vrot.slane %v127_v56, %v233_v45  ;;  %v819_v45 = vpack.c.bf16 %v572_v44, %v571_v43  ;;  %v828_v53 = vpack.c.bf16 %v578_v52, %v577_v51  ;;  %v831_v56 = vpack.c.bf16 %v580_v55, %v579_v54 }
  0xd3   :  { %v277_v10 = vsel %vm235_vm8, %v276_v61, %v272_v6  ;;  %v582_v6 = vld [vmem:[#allocation6 + $0x78] sm:$0xff] }
  0xd4   :  { %v163_v4 = vpop.xlane.xlu1 %162  ;;  %v236_v12 = vsel %vm235_vm8, %v234_v0, %v229_v9  ;;  %817 = vmatpush3.bf16.msra.mxu1 %v816_v42  ;;  %v555_v9 = vsub.s32 0, %v1058_v26 }
  0xd5   :  { %v281_v7 = vrot.slane %v163_v4, %v240_v57  ;;  %v131_v8 = vpop.xlane.xlu0 %130  ;;  %818 = vmatprep.subr.bf16.mxu1 %v927_v3 }
  0xd6   :  { %v241_v11 = vrot.slane %v131_v8, %v240_v57  ;;  %v550_v8 = vld [vmem:[%s1150_s6] sm:$0x1]  ;;  %s660_s6 = sshll.u32 %s931_s26, 4  ;;  %s661_s6 = int_to_ptr.vmem [resolvable:$true] %s660_s6 }
  0xd7   :  { %v282_v14 = vsel %vm242_vm9, %v281_v7, %v277_v10  ;;  %vm551_vm13 = vcmp.ge.f32.partialorder %v550_v8, 0.0  ;;  %v930_v10 = vmov 0   ;;  %s893_s27 = scalar_lea.vmem %s661_s6, 32  ;;  %p898_p3 = scmp.lt.s32.totalorder %s661_s6, %s661_s6 }
  0xd8   :  { %v243_v15 = vsel %vm242_vm9, %v241_v11, %v236_v12  ;;  %820 = vmatpush3.bf16.msra.mxu1 %v819_v45  ;;  %v560_v11 = vsel %vm551_vm13, 1, %v930_v10  ;;  %p894_p2 = scmp.ne.s32.totalorder %s661_s6, %s893_s27  ;;  %p899_p4 = scmp.lt.s32.totalorder %s893_s27, %s893_s27 }
  0xd9   :  { %v284_v16 = vsel %vm283_vm10, %v282_v14, %v243_v15  ;;  %821 = vmatprep.subr.bf16.mxu1 %v927_v3  ;;  %v564_v12 = vrot.slane %v560_v11, %v555_v9  ;;  %v556_v14 = vrot.slane %v550_v8, %v555_v9 }
  0xda   :  { %729 = vmatmul.mubr.msk.f32.vlgmr.msra.gmra.mrb[0].mxu0 %vm285_vm11, %v284_v16  ;;  %p900_p5 = por %p899_p4, %p898_p3 }
  0xdb   :  { %739 = vmatprep.mubr.msk.f32.mxu0 %vm929_vm2, %v928_v13  ;;  %802 = vmatpush3.bf16.msra.mxu0 %v801_v19  ;;  %vm565_vm14 = vcmp.eq.s32.totalorder %v564_v12, 1 }
  0xdc   :  { %803 = vmatprep.subr.bf16.mxu0 %v927_v3  ;;  %p901_p6 = pnand %p900_p5, %p894_p2 }
  0xdf   :  { %805 = vmatpush3.bf16.msra.mxu0 %v804_v22 }
  0xe0   :  { %806 = vmatprep.subr.bf16.mxu0 %v927_v3 }
 0x1ad   :  { %v354_v24 = vpop.f32.mrb[0].mxu0 }
 0x1ae   :  { %v358_v25 = vadd.f32 %v354_v24, %v164_v23  ;;  %v730_v27 = vpop.f32.mrb[1].mxu0 }
 0x1b0   :  { %360 = vst.msk [vmem:[#allocation2] sm:$0x3] %vm65_vm1, %v358_v25 }
 0x1b7   :  { %v364_v31 = vld [vmem:[#allocation2] sm:$0x3] }
 0x1b8   :  { %v372_v33 = vadd.f32 %v671_v30, %v364_v31 }
 0x1ba   :  { %740 = vmatmul.mubr.msk.f32.vlgmr.msra.gmra.mrb[2].mxu0 %vm384_vm12, %v372_v33 }
 0x1bb   :  { %808 = vmatpush3.bf16.msra.mxu0 %v807_v32  ;;  %750 = vmatprep.mubr.msk.f32.mxu0 %vm929_vm2, %v928_v13  ;;  %v573_v13 = vld [vmem:[#allocation6 + $0x30] sm:$0xff] }
 0x1bc   :  { %809 = vmatprep.subr.bf16.mxu0 %v927_v3  ;;  %v822_v47 = vpack.c.bf16 %v574_v46, %v573_v13 }
 0x1be   :  { %823 = vmatpush3.bf16.msra.mxu1 %v822_v47 }
 0x1bf   :  { %811 = vmatpush3.bf16.msra.mxu0 %v810_v36  ;;  %824 = vmatprep.subr.bf16.mxu1 %v927_v3 }
 0x1c2   :  { %751 = vmatmul.mubr.msk.f32.vlgmr.msra.gmra.mrb[4].mxu0 %vm384_vm12, %v372_v33  ;;  %826 = vmatpush3.bf16.msra.mxu1 %v825_v50 }
 0x1c3   :  { %827 = vmatprep.subr.bf16.mxu1 %v927_v3 }
 0x1c6   :  { %829 = vmatpush3.bf16.msra.mxu1 %v828_v53 }
 0x1c7   :  { %830 = vmatprep.subr.bf16.mxu1 %v927_v3 }
 0x1ca   :  { %832 = vmatpush3.bf16.msra.mxu1 %v831_v56 }
 0x1cb   :  { %833 = vmatprep.subr.bf16.mxu1 %v927_v3  ;;  %v581_v3 = vld [vmem:[#allocation6 + $0x70] sm:$0xff] }
 0x1cc   :  { %v834_v7 = vpack.c.bf16 %v582_v6, %v581_v3 }
 0x1ce   :  { %835 = vmatpush3.bf16.msra.mxu1 %v834_v7 }
 0x28d   :  { %v454_v57 = vpop.f32.mrb[2].mxu0 }
 0x28e   :  { %v741_v58 = vpop.f32.mrb[3].mxu0  ;;  %v455_v21 = vadd.f32 %v672_v20, %v454_v57 }
 0x295   :  { %v528_v59 = vpop.f32.mrb[4].mxu0 }
 0x296   :  { %v533_v60 = vmul.f32 0.2, %v528_v59  ;;  %v752_v61 = vpop.f32.mrb[5].mxu0 }
 0x298   :  { %v534_v63 = vmax.f32 %v528_v59, %v533_v60  ;;  %v545_v0 = vmin.f32 %v528_v59, %v533_v60 }
 0x29a   :  { %v546_v1 = vmul.f32 %v675_v62, %v545_v0  ;;  %v541_v2 = vmul.f32 %v675_v62, %v534_v63 }
 0x29c   :  { %v547_v4 = vsel %vm65_vm1, %v546_v1, 0.0  ;;  %v542_v5 = vsel %vm65_vm1, %v541_v2, 0.0 }
 0x29d   :  { %548 = vadd.xlane.f32.xlu1 %v547_v4  ;;  %543 = vadd.xlane.f32.xlu0 %v542_v5 }
 0x32a   :  { %v549_v15 = vpop.xlane.xlu1 %548  ;;  %v544_v16 = vpop.xlane.xlu0 %543 }
 0x32b   :  { %v559_v17 = vmul.f32 %v556_v14, %v549_v15  ;;  %v558_v18 = vmul.f32 %v556_v14, %v544_v16 }
 0x32d   :  { %v566_v19 = vsel %vm565_vm14, %v558_v18, %v559_v17 }
 0x32e   :  { %786 = vmatmul.mubr.f32.vlgmr.msra.gmra.mrb[0].mxu1 %v566_v19 }
 0x401   :  { %v649_v22 = vpop.f32.mrb[0].mxu1 }
 0x402   :  { %v650_v26 = vadd.f32 %v649_v22, %v455_v21  ;;  %v787_v23 = vpop.f32.mrb[1].mxu1 }
 0x404   :  { %653 = vst [vmem:[#allocation8] sm:$0x3] %v650_v26 }
 0x405   :  { %904 = shalt.err (!%p901_p6)
}
 0x406   :  { %s905_s1 = scalar_lea.hbm %s1153_s9, 32 }
 0x407   :  { %p906_p7 = scmp.ne.s32.totalorder %s1153_s9, %s905_s1  ;;  %p909_p8 = scmp.lt.u32.totalorder %s905_s1, %s1153_s9 }
 0x409   :  { %p911_p9 = pnand %p909_p8, %p906_p7 }
 0x40b   :  { %914 = shalt.err (!%p911_p9)
}
 0x40c   :  { %663 = dma.vmem_to_hbm [thread:$0]  %s661_s6, 32, %s1153_s9, [#allocation5]  }
 0x40d   :  { %919 = dma.done.wait [#allocation5], 32  }
 0x40e   :  { %920 = vsyncadd [#allocation5], 4294967264 }
 0x40f   :  { %667 = vsyncpa [#allocation4], 1 }
 0x410   :  { %668 = vsyncpa [#allocation7], 1 }
 0x411   :  { %669 = vsyncpa [#allocation5], 1 }

// kernel: tpu_custom_call.1
= control target key start
LH: loop header
LB: loop body
LE: loop exit
PB: predicated region body
PF: predicated region fallthrough
CT: control target
= control target key end

     0   :  { %14 = vsyncpa [#allocation4], 0  ;;  %s1144_s0 = inlined_call_operand.hbm [shape: f32[2,64,196], index: 0, kind: input, shape index: {}]   ;;  %s1145_s1 = inlined_call_operand.vmem [shape: f32[64,32], index: 1, kind: input, shape index: {}]   ;;  %s1146_s2 = inlined_call_operand.vmem [shape: f32[1,32], index: 2, kind: input, shape index: {}]   ;;  %s1147_s3 = inlined_call_operand.vmem [shape: f32[32,128], index: 3, kind: input, shape index: {}]   ;;  %s1148_s4 = inlined_call_operand.vmem [shape: f32[1,128], index: 4, kind: input, shape index: {}]   ;;  %s1149_s5 = inlined_call_operand.hbm [shape: f32[128,128], index: 5, kind: input, shape index: {}]   ;;  %s1150_s6 = inlined_call_operand.vmem [shape: f32[1,128], index: 6, kind: input, shape index: {}]   ;;  %s1151_s7 = inlined_call_operand.vmem [shape: f32[32,32], index: 7, kind: input, shape index: {}]   ;;  %s1152_s8 = inlined_call_operand.vmem [shape: f32[1,32], index: 8, kind: input, shape index: {}]   ;;  %s1153_s9 = inlined_call_operand.hbm [shape: f32[2,128], index: 9, kind: output, shape index: {}]  }
   0x1   :  { %15 = vsyncpa [#allocation7], 0 }
   0x2   :  { %16 = vsyncpa [#allocation5], 0  ;;  %s921_s30 = smov [#allocation3]   ;;  %s849_s13 = scalar_lea.hbm %s1144_s0, 4096 }
   0x3   :  { %s22_s10 = sshll.u32 %s921_s30, 4  ;;  %p850_p0 = scmp.ne.s32.totalorder %s1144_s0, %s849_s13  ;;  %s23_s10 = int_to_ptr.vmem [resolvable:$true] %s22_s10 }
   0x4   :  { %p853_p1 = scmp.lt.u32.totalorder %s849_s13, %s1144_s0 }
   0x6   :  { %p855_p2 = pnand %p853_p1, %p850_p0 }
   0x8   :  { %858 = shalt.err (!%p855_p2)
}
   0x9   :  { %s859_s18 = scalar_lea.vmem %s23_s10, 4096  ;;  %p864_p4 = scmp.lt.s32.totalorder %s23_s10, %s23_s10 }
   0xa   :  { %p860_p3 = scmp.ne.s32.totalorder %s23_s10, %s859_s18  ;;  %p865_p5 = scmp.lt.s32.totalorder %s859_s18, %s859_s18 }
   0xc   :  { %p866_p6 = por %p865_p5, %p864_p4 }
   0xe   :  { %p867_p7 = pnand %p866_p6, %p860_p3 }
  0x10   :  { %870 = shalt.err (!%p867_p7)
}
  0x11   :  { %s922_s19 = smov 256   ;;  %s923_s20 = smov 16  }
  0x12   :  { %28 = dma.hbm_to_vmem [thread:$0]  %s1144_s0, 4096, %s23_s10, [#allocation4], %s922_s19, %s922_s19, %s923_s20  }
  0x13   :  { %s924_s23 = smov [#allocation6]   ;;  %s871_s27 = scalar_lea.hbm %s1149_s5, 2048 }
  0x14   :  { %s42_s24 = sshll.u32 %s924_s23, 4  ;;  %p872_p8 = scmp.ne.s32.totalorder %s1149_s5, %s871_s27  ;;  %s43_s24 = int_to_ptr.vmem [resolvable:$true] %s42_s24 }
  0x15   :  { %p875_p9 = scmp.lt.u32.totalorder %s871_s27, %s1149_s5 }
  0x17   :  { %p877_p10 = pnand %p875_p9, %p872_p8 }
  0x19   :  { %880 = shalt.err (!%p877_p10)
}
  0x1a   :  { %s881_s12 = scalar_lea.vmem %s43_s24, 2048  ;;  %p886_p12 = scmp.lt.s32.totalorder %s43_s24, %s43_s24 }
  0x1b   :  { %p882_p11 = scmp.ne.s32.totalorder %s43_s24, %s881_s12  ;;  %p887_p13 = scmp.lt.s32.totalorder %s881_s12, %s881_s12 }
  0x1d   :  { %p888_p0 = por %p887_p13, %p886_p12 }
  0x1f   :  { %p889_p1 = pnand %p888_p0, %p882_p11 }
  0x21   :  { %892 = shalt.err (!%p889_p1)
}
  0x22   :  { %s925_s0 = smov 128   ;;  %s926_s10 = smov 8  }
  0x23   :  { %48 = dma.hbm_to_vmem [thread:$0]  %s1149_s5, 2048, %s43_s24, [#allocation7], %s925_s0, %s925_s0, %s926_s10  }
  0x24   :  { %915 = dma.done.wait [#allocation4], 4096  }
  0x25   :  { %916 = vsyncadd [#allocation4], 4294963200 }
  0x26   :  { %917 = dma.done.wait [#allocation7], 2048  }
  0x27   :  { %918 = vsyncadd [#allocation7], 4294965248  ;;  %vm99_vm0 = vcmask 556032   ;;  %v83_v0 = vld [vmem:[#allocation3 + $0x80] sm:$0xff]  ;;  %v84_v1 = vld [vmem:[#allocation3 + $0x88] sm:$0xff]  ;;  %vm65_vm1 = vcmask 254976  }
  0x28   :  { %v67_v2 = vld [vmem:[#allocation3] sm:$0xff]  ;;  %v132_v3 = vsel %vm99_vm0, %v84_v1, -inf  ;;  %v68_v4 = vld [vmem:[#allocation3 + $0x8] sm:$0xff]  ;;  %v85_v5 = vld [vmem:[#allocation3 + $0x90] sm:$0xff]  ;;  %vm929_vm2 = vmmov 0   ;;  %vm200_vm3 = vcmask 130112  }
  0x29   :  { %v86_v6 = vld [vmem:[#allocation3 + $0x98] sm:$0xff]  ;;  %v133_v7 = vmax.f32 %v83_v0, %v132_v3  ;;  %v100_v8 = vsel %vm99_vm0, %v68_v4, -inf  ;;  %v69_v10 = vld [vmem:[#allocation3 + $0x10] sm:$0xff]  ;;  %v88_v14 = vld [vmem:[#allocation3 + $0xa8] sm:$0xff]  ;;  %v927_v3 = vmov 0.0|0.0   ;;  %vm207_vm4 = vcmask 195712  }
  0x2a   :  { %v136_v9 = vsel %vm99_vm0, %v86_v6, -inf  ;;  %v70_v11 = vld [vmem:[#allocation3 + $0x18] sm:$0xff]  ;;  %v101_v12 = vmax.f32 %v67_v2, %v100_v8  ;;  %v72_v15 = vld [vmem:[#allocation3 + $0x28] sm:$0xff]  ;;  %v87_v18 = vld [vmem:[#allocation3 + $0xa0] sm:$0xff]  ;;  %v140_v19 = vsel %vm99_vm0, %v88_v14, -inf  ;;  %788 = vmatprep.subr.bf16.mxu0 %v927_v3  ;;  %812 = vmatprep.subr.bf16.mxu1 %v927_v3  ;;  %vm214_vm5 = vcmask 261312  }
  0x2b   :  { %v104_v13 = vsel %vm99_vm0, %v70_v11, -inf  ;;  %134 = vmax.xlane.f32.xlu1 %v133_v7  ;;  %v137_v16 = vmax.f32 %v85_v5, %v136_v9  ;;  %v71_v20 = vld [vmem:[#allocation3 + $0x20] sm:$0xff]  ;;  %v108_v21 = vsel %vm99_vm0, %v72_v15, -inf  ;;  %v90_v22 = vld [vmem:[#allocation3 + $0xb8] sm:$0xff]  ;;  %v141_v24 = vmax.f32 %v87_v18, %v140_v19  ;;  %v89_v26 = vld [vmem:[#allocation3 + $0xb0] sm:$0xff]  ;;  %s931_s26 = smov [#allocation8]  }
  0x2c   :  { %102 = vmax.xlane.f32.xlu0 %v101_v12  ;;  %v105_v17 = vmax.f32 %v69_v10, %v104_v13  ;;  %v74_v23 = vld [vmem:[#allocation3 + $0x38] sm:$0xff]  ;;  %v109_v25 = vmax.f32 %v71_v20, %v108_v21  ;;  %v144_v27 = vsel %vm99_vm0, %v90_v22, -inf  ;;  %v73_v28 = vld [vmem:[#allocation3 + $0x30] sm:$0xff]  ;;  %v92_v30 = vld [vmem:[#allocation3 + $0xc8] sm:$0xff]  ;;  %v928_v13 = vmov 0.0  }
  0x2d   :  { %v112_v29 = vsel %vm99_vm0, %v74_v23, -inf  ;;  %v76_v31 = vld [vmem:[#allocation3 + $0x48] sm:$0xff]  ;;  %v145_v32 = vmax.f32 %v89_v26, %v144_v27  ;;  %v91_v34 = vld [vmem:[#allocation3 + $0xc0] sm:$0xff]  ;;  %v148_v35 = vsel %vm99_vm0, %v92_v30, -inf  ;;  %v94_v38 = vld [vmem:[#allocation3 + $0xd8] sm:$0xff]  ;;  %728 = vmatprep.mubr.msk.f32.mxu0 %vm929_vm2, %v928_v13  ;;  %785 = vmatprep.mubr.msk.f32.mxu1 %vm929_vm2, %v928_v13  ;;  %v189_v18 = vlaneseq }
  0x2e   :  { %v113_v33 = vmax.f32 %v73_v28, %v112_v29  ;;  %v75_v36 = vld [vmem:[#allocation3 + $0x40] sm:$0xff]  ;;  %v116_v37 = vsel %vm99_vm0, %v76_v31, -inf  ;;  %v78_v39 = vld [vmem:[#allocation3 + $0x58] sm:$0xff]  ;;  %v149_v40 = vmax.f32 %v91_v34, %v148_v35  ;;  %v93_v42 = vld [vmem:[#allocation3 + $0xd0] sm:$0xff]  ;;  %v152_v43 = vsel %vm99_vm0, %v94_v38, -inf }
  0x2f   :  { %138 = vmax.xlane.f32.xlu1 %v137_v16  ;;  %v117_v41 = vmax.f32 %v75_v36, %v116_v37  ;;  %v77_v44 = vld [vmem:[#allocation3 + $0x50] sm:$0xff]  ;;  %v120_v45 = vsel %vm99_vm0, %v78_v39, -inf  ;;  %v96_v46 = vld [vmem:[#allocation3 + $0xe8] sm:$0xff]  ;;  %v153_v48 = vmax.f32 %v93_v42, %v152_v43  ;;  %v95_v50 = vld [vmem:[#allocation3 + $0xe0] sm:$0xff]  ;;  %66 = vst.msk [vmem:[#allocation2] sm:$0x3] %vm65_vm1, %v928_v13 }
  0x30   :  { %106 = vmax.xlane.f32.xlu0 %v105_v17  ;;  %v80_v47 = vld [vmem:[#allocation3 + $0x68] sm:$0xff]  ;;  %v121_v49 = vmax.f32 %v77_v44, %v120_v45  ;;  %v156_v51 = vsel %vm99_vm0, %v96_v46, -inf  ;;  %v79_v52 = vld [vmem:[#allocation3 + $0x60] sm:$0xff]  ;;  %v98_v54 = vld [vmem:[#allocation3 + $0xf8] sm:$0xff]  ;;  %v190_v21 = vand.u32 127, %v189_v18  ;;  %v1058_v26 = vshrl.u32 %v189_v18, 7 }
  0x31   :  { %v124_v53 = vsel %vm99_vm0, %v80_v47, -inf  ;;  %v82_v55 = vld [vmem:[#allocation3 + $0x78] sm:$0xff]  ;;  %v157_v56 = vmax.f32 %v95_v50, %v156_v51  ;;  %v97_v58 = vld [vmem:[#allocation3 + $0xf0] sm:$0xff]  ;;  %v160_v59 = vsel %vm99_vm0, %v98_v54, -inf  ;;  %v166_v1 = vld [vmem:[%s1145_s1 + $0x8] sm:$0xff]  ;;  %vm221_vm6 = vcmask 326912  }
  0x32   :  { %v125_v57 = vmax.f32 %v79_v52, %v124_v53  ;;  %v81_v60 = vld [vmem:[#allocation3 + $0x70] sm:$0xff]  ;;  %v128_v61 = vsel %vm99_vm0, %v82_v55, -inf  ;;  %v161_v62 = vmax.f32 %v97_v58, %v160_v59  ;;  %v165_v0 = vld [vmem:[%s1145_s1] sm:$0xff]  ;;  %v170_v8 = vld [vmem:[%s1145_s1 + $0x28] sm:$0xff]  ;;  %v195_v23 = vadd.s32 4294967288, %v190_v21 }
  0x33   :  { %142 = vmax.xlane.f32.xlu1 %v141_v24  ;;  %v129_v63 = vmax.f32 %v81_v60, %v128_v61  ;;  %v789_v2 = vpack.c.bf16 %v166_v1, %v165_v0  ;;  %v167_v4 = vld [vmem:[%s1145_s1 + $0x10] sm:$0xff]  ;;  %v168_v5 = vld [vmem:[%s1145_s1 + $0x18] sm:$0xff]  ;;  %v169_v7 = vld [vmem:[%s1145_s1 + $0x20] sm:$0xff]  ;;  %v209_v27 = vadd.s32 4294967272, %v190_v21  ;;  %v216_v28 = vadd.s32 4294967264, %v190_v21 }
  0x34   :  { %110 = vmax.xlane.f32.xlu0 %v109_v25  ;;  %v792_v6 = vpack.c.bf16 %v168_v5, %v167_v4  ;;  %v795_v9 = vpack.c.bf16 %v170_v8, %v169_v7  ;;  %v171_v10 = vld [vmem:[%s1145_s1 + $0x30] sm:$0xff]  ;;  %v172_v11 = vld [vmem:[%s1145_s1 + $0x38] sm:$0xff]  ;;  %v202_v25 = vadd.s32 4294967280, %v190_v21  ;;  %v198_v30 = vsub.s32 %v195_v23, %v1058_v26  ;;  %v374_v18 = vld [vmem:[%s1147_s3 + $0x8] sm:$0xff] }
  0x35   :  { %790 = vmatpush3.bf16.msra.mxu0 %v789_v2  ;;  %v798_v12 = vpack.c.bf16 %v172_v11, %v171_v10  ;;  %v230_v34 = vadd.s32 4294967248, %v190_v21  ;;  %v193_v35 = vsub.s32 %v190_v21, %v1058_v26  ;;  %v212_v36 = vsub.s32 %v209_v27, %v1058_v26 }
  0x36   :  { %791 = vmatprep.subr.bf16.mxu0 %v927_v3  ;;  %v219_v37 = vsub.s32 %v216_v28, %v1058_v26  ;;  %v237_v42 = vadd.s32 4294967240, %v190_v21  ;;  %vm228_vm7 = vcmask 392512   ;;  %vm235_vm8 = vcmask 458112   ;;  %v164_v23 = vld [vmem:[#allocation2] sm:$0x3] }
  0x37   :  { %146 = vmax.xlane.f32.xlu1 %v145_v32  ;;  %v223_v32 = vadd.s32 4294967256, %v190_v21  ;;  %v233_v45 = vsub.s32 %v230_v34, %v1058_v26  ;;  %vm242_vm9 = vcmask 523712   ;;  %vm283_vm10 = vcmask 1041409   ;;  %v376_v21 = vld [vmem:[%s1147_s3 + $0x18] sm:$0xff]  ;;  %v458_v28 = vld [vmem:[%s1151_s7] sm:$0xff]  ;;  %v460_v34 = vld [vmem:[%s1151_s7 + $0x10] sm:$0xff] }
  0x38   :  { %114 = vmax.xlane.f32.xlu0 %v113_v33  ;;  %v205_v33 = vsub.s32 %v202_v25, %v1058_v26  ;;  %vm285_vm11 = vcmask 523264   ;;  %vm384_vm12 = vcmask 261120  }
  0x39   :  { %793 = vmatpush3.bf16.msra.mxu0 %v792_v6 }
  0x3a   :  { %794 = vmatprep.subr.bf16.mxu0 %v927_v3 }
  0x3b   :  { %150 = vmax.xlane.f32.xlu1 %v149_v40  ;;  %v226_v40 = vsub.s32 %v223_v32, %v1058_v26 }
  0x3c   :  { %118 = vmax.xlane.f32.xlu0 %v117_v41 }
  0x3d   :  { %796 = vmatpush3.bf16.msra.mxu0 %v795_v9 }
  0x3e   :  { %797 = vmatprep.subr.bf16.mxu0 %v927_v3 }
  0x3f   :  { %154 = vmax.xlane.f32.xlu1 %v153_v48 }
  0x40   :  { %122 = vmax.xlane.f32.xlu0 %v121_v49 }
  0x41   :  { %799 = vmatpush3.bf16.msra.mxu0 %v798_v12 }
  0x42   :  { %800 = vmatprep.subr.bf16.mxu0 %v927_v3 }
  0x43   :  { %158 = vmax.xlane.f32.xlu1 %v157_v56 }
  0x44   :  { %126 = vmax.xlane.f32.xlu0 %v125_v57  ;;  %v240_v57 = vsub.s32 %v237_v42, %v1058_v26 }
  0x47   :  { %162 = vmax.xlane.f32.xlu1 %v161_v62 }
  0x48   :  { %130 = vmax.xlane.f32.xlu0 %v129_v63 }
  0xb8   :  { %v135_v14 = vpop.xlane.xlu1 %134 }
  0xb9   :  { %v103_v15 = vpop.xlane.xlu0 %102  ;;  %v247_v46 = vrot.slane %v135_v14, %v193_v35 }
  0xba   :  { %v194_v49 = vrot.slane %v103_v15, %v193_v35  ;;  %v461_v35 = vld [vmem:[%s1151_s7 + $0x18] sm:$0xff] }
  0xbc   :  { %v139_v16 = vpop.xlane.xlu1 %138 }
  0xbd   :  { %v107_v17 = vpop.xlane.xlu0 %106  ;;  %v251_v39 = vrot.slane %v139_v16, %v198_v30 }
  0xbe   :  { %v199_v43 = vrot.slane %v107_v17, %v198_v30  ;;  %v373_v17 = vld [vmem:[%s1147_s3] sm:$0xff] }
  0xbf   :  { %v252_v53 = vsel %vm200_vm3, %v251_v39, %v247_v46  ;;  %v671_v30 = vld [vmem:[%s1146_s2] ss:$0 sm:$0xff]  ;;  %v569_v39 = vld [vmem:[#allocation6 + $0x10] sm:$0xff] }
  0xc0   :  { %v143_v19 = vpop.xlane.xlu1 %142  ;;  %v201_v58 = vsel %vm200_vm3, %v199_v43, %v194_v49  ;;  %v571_v43 = vld [vmem:[#allocation6 + $0x20] sm:$0xff]  ;;  %v574_v46 = vld [vmem:[#allocation6 + $0x38] sm:$0xff]  ;;  %v576_v49 = vld [vmem:[#allocation6 + $0x48] sm:$0xff] }
  0xc1   :  { %v111_v20 = vpop.xlane.xlu0 %110  ;;  %v256_v44 = vrot.slane %v143_v19, %v205_v33  ;;  %v801_v19 = vpack.c.bf16 %v374_v18, %v373_v17 }
  0xc2   :  { %v206_v47 = vrot.slane %v111_v20, %v205_v33  ;;  %v375_v20 = vld [vmem:[%s1147_s3 + $0x10] sm:$0xff] }
  0xc3   :  { %v257_v59 = vsel %vm207_vm4, %v256_v44, %v252_v53  ;;  %v572_v44 = vld [vmem:[#allocation6 + $0x28] sm:$0xff] }
  0xc4   :  { %v147_v22 = vpop.xlane.xlu1 %146  ;;  %v208_v62 = vsel %vm207_vm4, %v206_v47, %v201_v58 }
  0xc5   :  { %v115_v24 = vpop.xlane.xlu0 %114  ;;  %v261_v48 = vrot.slane %v147_v22, %v212_v36  ;;  %v804_v22 = vpack.c.bf16 %v376_v21, %v375_v20  ;;  %v672_v20 = vld [vmem:[%s1148_s4] ss:$0 sm:$0xff] }
  0xc6   :  { %v213_v50 = vrot.slane %v115_v24, %v212_v36  ;;  %v810_v36 = vpack.c.bf16 %v461_v35, %v460_v34 }
  0xc7   :  { %v262_v63 = vsel %vm214_vm5, %v261_v48, %v257_v59  ;;  %v575_v48 = vld [vmem:[#allocation6 + $0x40] sm:$0xff] }
  0xc8   :  { %v151_v29 = vpop.xlane.xlu1 %150  ;;  %v215_v1 = vsel %vm214_vm5, %v213_v50, %v208_v62  ;;  %v825_v50 = vpack.c.bf16 %v576_v49, %v575_v48  ;;  %v675_v62 = vld [vmem:[%s1152_s8] ss:$0 sm:$0xff] }
  0xc9   :  { %v119_v31 = vpop.xlane.xlu0 %118  ;;  %v266_v51 = vrot.slane %v151_v29, %v219_v37  ;;  %v459_v29 = vld [vmem:[%s1151_s7 + $0x8] sm:$0xff] }
  0xca   :  { %v220_v54 = vrot.slane %v119_v31, %v219_v37  ;;  %v807_v32 = vpack.c.bf16 %v459_v29, %v458_v28  ;;  %v567_v37 = vld [vmem:[#allocation6] sm:$0xff] }
  0xcb   :  { %v267_v2 = vsel %vm221_vm6, %v266_v51, %v262_v63  ;;  %v577_v51 = vld [vmem:[#allocation6 + $0x50] sm:$0xff] }
  0xcc   :  { %v155_v38 = vpop.xlane.xlu1 %154  ;;  %v222_v5 = vsel %vm221_vm6, %v220_v54, %v215_v1  ;;  %v579_v54 = vld [vmem:[#allocation6 + $0x60] sm:$0xff] }
  0xcd   :  { %v123_v41 = vpop.xlane.xlu0 %122  ;;  %v271_v55 = vrot.slane %v155_v38, %v226_v40  ;;  %v568_v38 = vld [vmem:[#allocation6 + $0x8] sm:$0xff] }
  0xce   :  { %v227_v60 = vrot.slane %v123_v41, %v226_v40  ;;  %v813_v40 = vpack.c.bf16 %v568_v38, %v567_v37  ;;  %v570_v41 = vld [vmem:[#allocation6 + $0x18] sm:$0xff] }
  0xcf   :  { %v272_v6 = vsel %vm228_vm7, %v271_v55, %v267_v2  ;;  %v816_v42 = vpack.c.bf16 %v570_v41, %v569_v39  ;;  %v580_v55 = vld [vmem:[#allocation6 + $0x68] sm:$0xff] }
  0xd0   :  { %v159_v52 = vpop.xlane.xlu1 %158  ;;  %v229_v9 = vsel %vm228_vm7, %v227_v60, %v222_v5  ;;  %814 = vmatpush3.bf16.msra.mxu1 %v813_v40 }
  0xd1   :  { %v127_v56 = vpop.xlane.xlu0 %126  ;;  %v276_v61 = vrot.slane %v159_v52, %v233_v45  ;;  %815 = vmatprep.subr.bf16.mxu1 %v927_v3  ;;  %v578_v52 = vld [vmem:[#allocation6 + $0x58] sm:$0xff] }
  0xd2   :  { %v234_v0 = vrot.slane %v127_v56, %v233_v45  ;;  %v819_v45 = vpack.c.bf16 %v572_v44, %v571_v43  ;;  %v828_v53 = vpack.c.bf16 %v578_v52, %v577_v51  ;;  %v831_v56 = vpack.c.bf16 %v580_v55, %v579_v54 }
  0xd3   :  { %v277_v10 = vsel %vm235_vm8, %v276_v61, %v272_v6  ;;  %v582_v6 = vld [vmem:[#allocation6 + $0x78] sm:$0xff] }
  0xd4   :  { %v163_v4 = vpop.xlane.xlu1 %162  ;;  %v236_v12 = vsel %vm235_vm8, %v234_v0, %v229_v9  ;;  %817 = vmatpush3.bf16.msra.mxu1 %v816_v42  ;;  %v555_v9 = vsub.s32 0, %v1058_v26 }
  0xd5   :  { %v281_v7 = vrot.slane %v163_v4, %v240_v57  ;;  %v131_v8 = vpop.xlane.xlu0 %130  ;;  %818 = vmatprep.subr.bf16.mxu1 %v927_v3 }
  0xd6   :  { %v241_v11 = vrot.slane %v131_v8, %v240_v57  ;;  %v550_v8 = vld [vmem:[%s1150_s6] sm:$0x1]  ;;  %s660_s6 = sshll.u32 %s931_s26, 4  ;;  %s661_s6 = int_to_ptr.vmem [resolvable:$true] %s660_s6 }
  0xd7   :  { %v282_v14 = vsel %vm242_vm9, %v281_v7, %v277_v10  ;;  %vm551_vm13 = vcmp.ge.f32.partialorder %v550_v8, 0.0  ;;  %v930_v10 = vmov 0   ;;  %s893_s27 = scalar_lea.vmem %s661_s6, 32  ;;  %p898_p3 = scmp.lt.s32.totalorder %s661_s6, %s661_s6 }
  0xd8   :  { %v243_v15 = vsel %vm242_vm9, %v241_v11, %v236_v12  ;;  %820 = vmatpush3.bf16.msra.mxu1 %v819_v45  ;;  %v560_v11 = vsel %vm551_vm13, 1, %v930_v10  ;;  %p894_p2 = scmp.ne.s32.totalorder %s661_s6, %s893_s27  ;;  %p899_p4 = scmp.lt.s32.totalorder %s893_s27, %s893_s27 }
  0xd9   :  { %v284_v16 = vsel %vm283_vm10, %v282_v14, %v243_v15  ;;  %821 = vmatprep.subr.bf16.mxu1 %v927_v3  ;;  %v564_v12 = vrot.slane %v560_v11, %v555_v9  ;;  %v556_v14 = vrot.slane %v550_v8, %v555_v9 }
  0xda   :  { %729 = vmatmul.mubr.msk.f32.vlgmr.msra.gmra.mrb[0].mxu0 %vm285_vm11, %v284_v16  ;;  %p900_p5 = por %p899_p4, %p898_p3 }
  0xdb   :  { %739 = vmatprep.mubr.msk.f32.mxu0 %vm929_vm2, %v928_v13  ;;  %802 = vmatpush3.bf16.msra.mxu0 %v801_v19  ;;  %vm565_vm14 = vcmp.eq.s32.totalorder %v564_v12, 1 }
  0xdc   :  { %803 = vmatprep.subr.bf16.mxu0 %v927_v3  ;;  %p901_p6 = pnand %p900_p5, %p894_p2 }
  0xdf   :  { %805 = vmatpush3.bf16.msra.mxu0 %v804_v22 }
  0xe0   :  { %806 = vmatprep.subr.bf16.mxu0 %v927_v3 }
 0x1ad   :  { %v354_v24 = vpop.f32.mrb[0].mxu0 }
 0x1ae   :  { %v358_v25 = vadd.f32 %v354_v24, %v164_v23  ;;  %v730_v27 = vpop.f32.mrb[1].mxu0 }
 0x1b0   :  { %360 = vst.msk [vmem:[#allocation2] sm:$0x3] %vm65_vm1, %v358_v25 }
 0x1b7   :  { %v364_v31 = vld [vmem:[#allocation2] sm:$0x3] }
 0x1b8   :  { %v372_v33 = vadd.f32 %v671_v30, %v364_v31 }
 0x1ba   :  { %740 = vmatmul.mubr.msk.f32.vlgmr.msra.gmra.mrb[2].mxu0 %vm384_vm12, %v372_v33 }
 0x1bb   :  { %808 = vmatpush3.bf16.msra.mxu0 %v807_v32  ;;  %750 = vmatprep.mubr.msk.f32.mxu0 %vm929_vm2, %v928_v13  ;;  %v573_v13 = vld [vmem:[#allocation6 + $0x30] sm:$0xff] }
 0x1bc   :  { %809 = vmatprep.subr.bf16.mxu0 %v927_v3  ;;  %v822_v47 = vpack.c.bf16 %v574_v46, %v573_v13 }
 0x1be   :  { %823 = vmatpush3.bf16.msra.mxu1 %v822_v47 }
 0x1bf   :  { %811 = vmatpush3.bf16.msra.mxu0 %v810_v36  ;;  %824 = vmatprep.subr.bf16.mxu1 %v927_v3 }
 0x1c2   :  { %751 = vmatmul.mubr.msk.f32.vlgmr.msra.gmra.mrb[4].mxu0 %vm384_vm12, %v372_v33  ;;  %826 = vmatpush3.bf16.msra.mxu1 %v825_v50 }
 0x1c3   :  { %827 = vmatprep.subr.bf16.mxu1 %v927_v3 }
 0x1c6   :  { %829 = vmatpush3.bf16.msra.mxu1 %v828_v53 }
 0x1c7   :  { %830 = vmatprep.subr.bf16.mxu1 %v927_v3 }
 0x1ca   :  { %832 = vmatpush3.bf16.msra.mxu1 %v831_v56 }
 0x1cb   :  { %833 = vmatprep.subr.bf16.mxu1 %v927_v3  ;;  %v581_v3 = vld [vmem:[#allocation6 + $0x70] sm:$0xff] }
 0x1cc   :  { %v834_v7 = vpack.c.bf16 %v582_v6, %v581_v3 }
 0x1ce   :  { %835 = vmatpush3.bf16.msra.mxu1 %v834_v7 }
 0x28d   :  { %v454_v57 = vpop.f32.mrb[2].mxu0 }
 0x28e   :  { %v741_v58 = vpop.f32.mrb[3].mxu0  ;;  %v455_v21 = vadd.f32 %v672_v20, %v454_v57 }
 0x295   :  { %v528_v59 = vpop.f32.mrb[4].mxu0 }
 0x296   :  { %v533_v60 = vmul.f32 0.2, %v528_v59  ;;  %v752_v61 = vpop.f32.mrb[5].mxu0 }
 0x298   :  { %v534_v63 = vmax.f32 %v528_v59, %v533_v60  ;;  %v545_v0 = vmin.f32 %v528_v59, %v533_v60 }
 0x29a   :  { %v546_v1 = vmul.f32 %v675_v62, %v545_v0  ;;  %v541_v2 = vmul.f32 %v675_v62, %v534_v63 }
 0x29c   :  { %v547_v4 = vsel %vm65_vm1, %v546_v1, 0.0  ;;  %v542_v5 = vsel %vm65_vm1, %v541_v2, 0.0 }
 0x29d   :  { %548 = vadd.xlane.f32.xlu1 %v547_v4  ;;  %543 = vadd.xlane.f32.xlu0 %v542_v5 }
 0x32a   :  { %v549_v15 = vpop.xlane.xlu1 %548  ;;  %v544_v16 = vpop.xlane.xlu0 %543 }
 0x32b   :  { %v559_v17 = vmul.f32 %v556_v14, %v549_v15  ;;  %v558_v18 = vmul.f32 %v556_v14, %v544_v16 }
 0x32d   :  { %v566_v19 = vsel %vm565_vm14, %v558_v18, %v559_v17 }
 0x32e   :  { %786 = vmatmul.mubr.f32.vlgmr.msra.gmra.mrb[0].mxu1 %v566_v19 }
 0x401   :  { %v649_v22 = vpop.f32.mrb[0].mxu1 }
 0x402   :  { %v650_v26 = vadd.f32 %v649_v22, %v455_v21  ;;  %v787_v23 = vpop.f32.mrb[1].mxu1 }
 0x404   :  { %653 = vst [vmem:[#allocation8] sm:$0x3] %v650_v26 }
 0x405   :  { %904 = shalt.err (!%p901_p6)
}
 0x406   :  { %s905_s1 = scalar_lea.hbm %s1153_s9, 32 }
 0x407   :  { %p906_p7 = scmp.ne.s32.totalorder %s1153_s9, %s905_s1  ;;  %p909_p8 = scmp.lt.u32.totalorder %s905_s1, %s1153_s9 }
 0x409   :  { %p911_p9 = pnand %p909_p8, %p906_p7 }
 0x40b   :  { %914 = shalt.err (!%p911_p9)
}
 0x40c   :  { %663 = dma.vmem_to_hbm [thread:$0]  %s661_s6, 32, %s1153_s9, [#allocation5]  }
 0x40d   :  { %919 = dma.done.wait [#allocation5], 32  }
 0x40e   :  { %920 = vsyncadd [#allocation5], 4294967264 }
 0x40f   :  { %667 = vsyncpa [#allocation4], 1 }
 0x410   :  { %668 = vsyncpa [#allocation7], 1 }
 0x411   :  { %669 = vsyncpa [#allocation5], 1 }

</bundles_post_ra>
